<compile_context>
chip_gen: v7x
topology: tpu7x:2x2x1
jax: 0.10.0
libtpu: 0.0.40
codegen_flags: <defaults>
</compile_context>

<pallas_src>
import functools
import math

import jax
import jax.numpy as jnp
from jax.experimental import pallas as pl
from jax.experimental.pallas import tpu as pltpu


# ----------------------------- Pallas kernel -------------------------------

def _encoder_kernel(t_ref, a_ref, v_ref, rt_ref, ra_ref, rv_ref,
                    tw_ref, tb_ref, aw_ref, ab_ref, vw_ref, vb_ref,
                    wt_ref, wa_ref, wv_ref, bin_ref, pe_ref,
                    wqkv_ref, bqkv_ref, wo_ref, bo_ref, g1_ref, be1_ref,
                    w1_ref, b1_ref, w2_ref, b2_ref, g2_ref, be2_ref,
                    wout_ref, bout_ref,
                    c_ref, mem_ref, x_ref,
                    *, nhead, d_k, d_v, eps):
    """Grid = (batch, layer).  One encoder layer per grid step; x lives in VMEM scratch."""
    f32 = jnp.float32
    bf16 = jnp.bfloat16
    Hq = nhead * d_k
    Hv = nhead * d_v
    scale = 1.0 / math.sqrt(d_k)
    l = pl.program_id(1)

    def layer_norm(y, g, b):
        mu = jnp.mean(y, axis=-1, keepdims=True)
        var = jnp.mean((y - mu) ** 2, axis=-1, keepdims=True)
        return (y - mu) * jax.lax.rsqrt(var + eps) * g + b

    # --- first layer step: fused input projection + positional encoding into the
    #     resident activation, plus the three modality projections (lane-dense concat).
    @pl.when(l == 0)
    def _init():
        x0 = (jnp.dot(t_ref[...].astype(bf16), wt_ref[...], preferred_element_type=f32)
              + jnp.dot(a_ref[...].astype(bf16), wa_ref[...], preferred_element_type=f32)
              + jnp.dot(v_ref[...].astype(bf16), wv_ref[...], preferred_element_type=f32)
              + bin_ref[...] + pe_ref[...])                              # (S, D) f32
        x_ref[...] = x0

        ct = jnp.dot(rt_ref[...].astype(bf16), tw_ref[...],
                     preferred_element_type=f32) + tb_ref[...]           # (1, Ht)
        ca = jnp.dot(ra_ref[...].astype(bf16), aw_ref[...],
                     preferred_element_type=f32) + ab_ref[...]           # (1, Ha)
        cv = jnp.dot(rv_ref[...].astype(bf16), vw_ref[...],
                     preferred_element_type=f32) + vb_ref[...]           # (1, Hv)
        c_ref[...] = jnp.concatenate([ct, ca, cv], axis=-1)              # (1, Ht+Ha+Hv)

    # --- one encoder layer (weights for layer l streamed via BlockSpec) ---
    x = x_ref[...]                                                       # (S, D) f32
    xb = x.astype(bf16)

    # fused QKV projection: one bf16 MXU push (S, D) x (D, 2*Hq + Hv)
    qkv = (jnp.dot(xb, wqkv_ref[...], preferred_element_type=f32)
           + bqkv_ref[...])                                              # (S, 2Hq+Hv) f32

    # head-batched attention: stack heads on a leading (non-lane) axis.
    q = jnp.stack([qkv[:, h * d_k:(h + 1) * d_k] for h in range(nhead)], axis=0)
    k = jnp.stack([qkv[:, Hq + h * d_k:Hq + (h + 1) * d_k] for h in range(nhead)], axis=0)
    v = jnp.stack([qkv[:, 2 * Hq + h * d_v:2 * Hq + (h + 1) * d_v] for h in range(nhead)],
                  axis=0)                                                # (H, S, d)

    s = jnp.einsum('hqd,hkd->hqk', q.astype(bf16), k.astype(bf16),
                   preferred_element_type=f32) * scale                   # (H, S, S) f32
    s = s - jnp.max(s, axis=-1, keepdims=True)
    p = jnp.exp(s)
    p = p * pl.reciprocal(jnp.sum(p, axis=-1, keepdims=True), approx=True)
    ctx = jnp.einsum('hqk,hkd->hqd', p.astype(bf16), v.astype(bf16),
                     preferred_element_type=f32)                         # (H, S, d_v)
    ctx2 = jnp.concatenate([ctx[h] for h in range(nhead)], axis=-1)      # (S, H*d_v)

    # single big-K output projection instead of H tiny accumulations
    attn = (jnp.dot(ctx2.astype(bf16), wo_ref[...], preferred_element_type=f32)
            + bo_ref[...])                                               # (S, D)

    x1 = layer_norm(x + attn, g1_ref[...], be1_ref[...])
    h1 = jnp.maximum(
        jnp.dot(x1.astype(bf16), w1_ref[...], preferred_element_type=f32) + b1_ref[...],
        0.0)
    ff = jnp.dot(h1.astype(bf16), w2_ref[...], preferred_element_type=f32) + b2_ref[...]
    x2 = layer_norm(x1 + ff, g2_ref[...], be2_ref[...])
    x_ref[...] = x2

    # --- last layer step: mean-pool over S commuted before the output projection.
    @pl.when(l == pl.num_programs(1) - 1)
    def _final():
        x_bar = jnp.mean(x2, axis=0, keepdims=True)                      # (1, D)
        mem_ref[...] = (jnp.dot(x_bar.astype(bf16), wout_ref[...],
                                preferred_element_type=f32) + bout_ref[...])


def encoder_and_modal_pallas(uni_t, uni_a, uni_v, rt, ra, rv, params, cfg):
    B, S, F_t = uni_t.shape
    F_a = uni_a.shape[-1]
    F_v = uni_v.shape[-1]
    D = cfg["d_model"]
    H, dk, dv, dff, L = cfg["nhead"], cfg["d_k"], cfg["d_v"], cfg["d_ff"], cfg["n_layer"]
    M = cfg["mfn_mem_dim"]
    Dqkv = 2 * H * dk + H * dv
    Ct = cfg["mfn_t_n_hidden"] + cfg["mfn_a_n_hidden"] + cfg["mfn_v_n_hidden"]
    pe = params["pos_enc"][:S]

    def const2(a):                      # full 2-D array, constant across the grid
        return pl.BlockSpec(a.shape, lambda b, l: (0, 0))

    def per_batch(shape):               # (B, *) arrays, one batch element per grid point
        return pl.BlockSpec((None,) + shape, lambda b, l: (b, 0, 0))

    def per_layer(shape):               # (L, *) stacked layer weights, streamed by layer
        return pl.BlockSpec((None,) + shape, lambda b, l: (l, 0, 0))

    args = (uni_t, uni_a, uni_v, rt, ra, rv,
            params["t_w"], params["t_b"], params["a_w"], params["a_b"],
            params["v_w"], params["v_b"],
            params["in_w_t"], params["in_w_a"], params["in_w_v"], params["in_b"], pe,
            params["wqkv"], params["bqkv"], params["wo"], params["bo"],
            params["ln1_g"], params["ln1_b"],
            params["w1"], params["b1"], params["w2"], params["b2"],
            params["ln2_g"], params["ln2_b"],
            params["out_w"], params["out_b"])

    in_specs = [
        per_batch((S, F_t)), per_batch((S, F_a)), per_batch((S, F_v)),
        per_batch((1, S * F_t)), per_batch((1, S * F_a)), per_batch((1, S * F_v)),
        const2(params["t_w"]), const2(params["t_b"]),
        const2(params["a_w"]), const2(params["a_b"]),
        const2(params["v_w"]), const2(params["v_b"]),
        const2(params["in_w_t"]), const2(params["in_w_a"]), const2(params["in_w_v"]),
        const2(params["in_b"]), const2(pe),
        per_layer((D, Dqkv)), per_layer((1, Dqkv)),
        per_layer((H * dv, D)), per_layer((1, D)),
        per_layer((1, D)), per_layer((1, D)),
        per_layer((D, dff)), per_layer((1, dff)),
        per_layer((dff, D)), per_layer((1, D)),
        per_layer((1, D)), per_layer((1, D)),
        const2(params["out_w"]), const2(params["out_b"]),
    ]
    out_shapes = (jax.ShapeDtypeStruct((B, 1, Ct), jnp.float32),
                  jax.ShapeDtypeStruct((B, 1, M), jnp.float32))
    out_specs = (pl.BlockSpec((None, 1, Ct), lambda b, l: (b, 0, 0)),
                 pl.BlockSpec((None, 1, M), lambda b, l: (b, 0, 0)))

    kernel = functools.partial(_encoder_kernel, nhead=H, d_k=dk, d_v=dv, eps=1e-5)
    return pl.pallas_call(
        kernel,
        out_shape=out_shapes,
        grid=(B, L),
        in_specs=in_specs,
        out_specs=out_specs,
        scratch_shapes=[pltpu.VMEM((S, D), jnp.float32)],
        compiler_params=pltpu.CompilerParams(
            dimension_semantics=("parallel", "arbitrary"),
            vmem_limit_bytes=32 * 1024 * 1024),
    )(*args)


# --------------------------- parameters / glue -----------------------------

def _sinusoidal_pe(max_len, d_model):
    pos = jnp.arange(max_len, dtype=jnp.float32)[:, None]
    i = jnp.arange(d_model, dtype=jnp.float32)[None, :]
    angle = pos / jnp.power(10000.0, (2.0 * jnp.floor(i / 2.0)) / d_model)
    pe = jnp.where((jnp.arange(d_model) % 2) == 0, jnp.sin(angle), jnp.cos(angle))
    return pe.astype(jnp.float32)                                     # (max_len, d_model)


def init_params(key, cfg):
    bf16 = jnp.bfloat16

    def dense(k, din, dout):
        w = jax.random.normal(k, (din, dout), jnp.float32) * 0.02
        b = jnp.zeros((1, dout), jnp.float32)
        return w, b

    D, H, dk, dv, dff, L = (cfg["d_model"], cfg["nhead"], cfg["d_k"], cfg["d_v"],
                            cfg["d_ff"], cfg["n_layer"])
    keys = jax.random.split(key, 8 + L)
    p = {}
    w, b = dense(keys[0], cfg["mul_t_in_dim"], cfg["mfn_t_n_hidden"])
    p["t_w"], p["t_b"] = w.astype(bf16), b
    w, b = dense(keys[1], cfg["mul_a_in_dim"], cfg["mfn_a_n_hidden"])
    p["a_w"], p["a_b"] = w.astype(bf16), b
    w, b = dense(keys[2], cfg["mul_v_in_dim"], cfg["mfn_v_n_hidden"])
    p["v_w"], p["v_b"] = w.astype(bf16), b

    # Input projection split by modality rows; equivalent to one (src_n_feature, D)
    # matrix applied to concat([t, a, v], axis=-1) -> avoids materializing the concat.
    kt, ka, kv = jax.random.split(keys[3], 3)
    w, p["in_b"] = dense(kt, cfg["f_t"], D); p["in_w_t"] = w.astype(bf16)
    w, _ = dense(ka, cfg["f_a"], D); p["in_w_a"] = w.astype(bf16)
    w, _ = dense(kv, cfg["f_v"], D); p["in_w_v"] = w.astype(bf16)

    w, p["out_b"] = dense(keys[4], D, cfg["mfn_mem_dim"]); p["out_w"] = w.astype(bf16)
    p["pos_enc"] = _sinusoidal_pe(cfg["max_seq_len"], D)

    wqkv, bqkv, wo_l, bo_l = [], [], [], []
    w1_l, b1_l, w2_l, b2_l = [], [], [], []
    g1, be1, g2, be2 = [], [], [], []
    for l in range(L):
        lk = jax.random.split(keys[5 + l], 6)
        wq, bq = dense(lk[0], D, H * dk)
        wk, bk = dense(lk[1], D, H * dk)
        wv, bv = dense(lk[2], D, H * dv)
        # fused QKV weight/bias: [Q | K | V] along the output dimension
        wqkv.append(jnp.concatenate([wq, wk, wv], axis=1).astype(bf16))
        bqkv.append(jnp.concatenate([bq, bk, bv], axis=1))
        w, b = dense(lk[3], H * dv, D); wo_l.append(w.astype(bf16)); bo_l.append(b)
        w, b = dense(lk[4], D, dff);    w1_l.append(w.astype(bf16)); b1_l.append(b)
        w, b = dense(lk[5], dff, D);    w2_l.append(w.astype(bf16)); b2_l.append(b)
        g1.append(jnp.ones((1, D), jnp.float32)); be1.append(jnp.zeros((1, D), jnp.float32))
        g2.append(jnp.ones((1, D), jnp.float32)); be2.append(jnp.zeros((1, D), jnp.float32))

    stack = lambda xs: jnp.stack(xs, axis=0)           # leading layer axis
    p["wqkv"], p["bqkv"] = stack(wqkv), stack(bqkv)    # (L, D, Dqkv), (L, 1, Dqkv)
    p["wo"], p["bo"] = stack(wo_l), stack(bo_l)
    p["w1"], p["b1"] = stack(w1_l), stack(b1_l)
    p["w2"], p["b2"] = stack(w2_l), stack(b2_l)
    p["ln1_g"], p["ln1_b"] = stack(g1), stack(be1)
    p["ln2_g"], p["ln2_b"] = stack(g2), stack(be2)
    return p


def multimodal_context_net(params, uni_t, uni_a, uni_v, cfg):
    B = uni_t.shape[0]
    # flattened (B, 1, S*F) views prepared in the wrapper (free HBM reshape),
    # so the kernel never needs a lane-crossing reshape for the modality FCs.
    rt = uni_t.reshape(B, 1, -1)
    ra = uni_a.reshape(B, 1, -1)
    rv = uni_v.reshape(B, 1, -1)

    c_all, mem = encoder_and_modal_pallas(uni_t, uni_a, uni_v, rt, ra, rv, params, cfg)

    Ht, Ha, Hv_ = cfg["mfn_t_n_hidden"], cfg["mfn_a_n_hidden"], cfg["mfn_v_n_hidden"]
    c_all = c_all.reshape(B, Ht + Ha + Hv_)
    mfn_c_t = c_all[:, :Ht]                          # dropout == identity at inference
    mfn_c_a = c_all[:, Ht:Ht + Ha]
    mfn_c_v = c_all[:, Ht + Ha:]
    mfn_mem = mem.reshape(B, cfg["mfn_mem_dim"])
    return mfn_c_t, mfn_c_a, mfn_c_v, mfn_mem


# --------------------------------- main ------------------------------------

if __name__ == "__main__":
    B, S = 2, 8
    F_t, F_a, F_v = 16, 8, 8
    cfg = dict(
        f_t=F_t, f_a=F_a, f_v=F_v,
        mul_t_in_dim=S * F_t, mul_a_in_dim=S * F_a, mul_v_in_dim=S * F_v,
        mfn_t_n_hidden=32, mfn_a_n_hidden=16, mfn_v_n_hidden=16,
        src_n_feature=F_t + F_a + F_v,
        mfn_mem_dim=32, max_seq_len=S,
        d_model=32, nhead=2, n_layer=1, d_ff=64, d_k=16, d_v=16,
    )

    key = jax.random.PRNGKey(0)
    k_t, k_a, k_v, k_p = jax.random.split(key, 4)
    uni_t = jax.random.normal(k_t, (B, S, F_t), jnp.float32)
    uni_a = jax.random.normal(k_a, (B, S, F_a), jnp.float32)
    uni_v = jax.random.normal(k_v, (B, S, F_v), jnp.float32)

    params = init_params(k_p, cfg)

    fwd = jax.jit(lambda t, a, v: multimodal_context_net(params, t, a, v, cfg))
    outs = fwd(uni_t, uni_a, uni_v)
    outs = jax.block_until_ready(outs)

    assert outs[0].shape == (B, cfg["mfn_t_n_hidden"])
    assert outs[1].shape == (B, cfg["mfn_a_n_hidden"])
    assert outs[2].shape == (B, cfg["mfn_v_n_hidden"])
    assert outs[3].shape == (B, cfg["mfn_mem_dim"])
    assert all(bool(jnp.all(jnp.isfinite(o))) for o in outs)
    print("KERNEL_OK")
</pallas_src>

<mosaic_0001>
module attributes {stable_mosaic.version = 11 : i64} {
  func.func @_encoder_kernel(%arg0: i32, %arg1: i32, %arg2: memref<1x8x16xf32, #tpu.memory_space<vmem>>, %arg3: memref<1x8x8xf32, #tpu.memory_space<vmem>>, %arg4: memref<1x8x8xf32, #tpu.memory_space<vmem>>, %arg5: memref<1x1x128xf32, #tpu.memory_space<vmem>>, %arg6: memref<1x1x64xf32, #tpu.memory_space<vmem>>, %arg7: memref<1x1x64xf32, #tpu.memory_space<vmem>>, %arg8: memref<128x32xbf16, #tpu.memory_space<vmem>>, %arg9: memref<1x32xf32, #tpu.memory_space<vmem>>, %arg10: memref<64x16xbf16, #tpu.memory_space<vmem>>, %arg11: memref<1x16xf32, #tpu.memory_space<vmem>>, %arg12: memref<64x16xbf16, #tpu.memory_space<vmem>>, %arg13: memref<1x16xf32, #tpu.memory_space<vmem>>, %arg14: memref<16x32xbf16, #tpu.memory_space<vmem>>, %arg15: memref<8x32xbf16, #tpu.memory_space<vmem>>, %arg16: memref<8x32xbf16, #tpu.memory_space<vmem>>, %arg17: memref<1x32xf32, #tpu.memory_space<vmem>>, %arg18: memref<8x32xf32, #tpu.memory_space<vmem>>, %arg19: memref<1x32x96xbf16, #tpu.memory_space<vmem>>, %arg20: memref<1x1x96xf32, #tpu.memory_space<vmem>>, %arg21: memref<1x32x32xbf16, #tpu.memory_space<vmem>>, %arg22: memref<1x1x32xf32, #tpu.memory_space<vmem>>, %arg23: memref<1x1x32xf32, #tpu.memory_space<vmem>>, %arg24: memref<1x1x32xf32, #tpu.memory_space<vmem>>, %arg25: memref<1x32x64xbf16, #tpu.memory_space<vmem>>, %arg26: memref<1x1x64xf32, #tpu.memory_space<vmem>>, %arg27: memref<1x64x32xbf16, #tpu.memory_space<vmem>>, %arg28: memref<1x1x32xf32, #tpu.memory_space<vmem>>, %arg29: memref<1x1x32xf32, #tpu.memory_space<vmem>>, %arg30: memref<1x1x32xf32, #tpu.memory_space<vmem>>, %arg31: memref<32x32xbf16, #tpu.memory_space<vmem>>, %arg32: memref<1x32xf32, #tpu.memory_space<vmem>>, %arg33: memref<1x1x64xf32, #tpu.memory_space<vmem>>, %arg34: memref<1x1x32xf32, #tpu.memory_space<vmem>>, %arg35: memref<8x32xf32, #tpu.memory_space<vmem>>) attributes {dimension_semantics = [#tpu.dimension_semantics<parallel>, #tpu.dimension_semantics<arbitrary>], iteration_bounds = array<i64: 2, 1>, scalar_prefetch = 0 : i64, scratch_operands = 1 : i64, tpu.core_type = #tpu.core_type<tc>, window_params = [{transform_indices = @transform_0, window_bounds = array<i64: 1, 8, 16>}, {transform_indices = @transform_1, window_bounds = array<i64: 1, 8, 8>}, {transform_indices = @transform_2, window_bounds = array<i64: 1, 8, 8>}, {transform_indices = @transform_3, window_bounds = array<i64: 1, 1, 128>}, {transform_indices = @transform_4, window_bounds = array<i64: 1, 1, 64>}, {transform_indices = @transform_5, window_bounds = array<i64: 1, 1, 64>}, {pipeline_mode = #tpu.pipeline_mode<synchronous>, transform_indices = @transform_6, window_bounds = array<i64: 128, 32>}, {pipeline_mode = #tpu.pipeline_mode<synchronous>, transform_indices = @transform_7, window_bounds = array<i64: 1, 32>}, {pipeline_mode = #tpu.pipeline_mode<synchronous>, transform_indices = @transform_8, window_bounds = array<i64: 64, 16>}, {pipeline_mode = #tpu.pipeline_mode<synchronous>, transform_indices = @transform_9, window_bounds = array<i64: 1, 16>}, {pipeline_mode = #tpu.pipeline_mode<synchronous>, transform_indices = @transform_10, window_bounds = array<i64: 64, 16>}, {pipeline_mode = #tpu.pipeline_mode<synchronous>, transform_indices = @transform_11, window_bounds = array<i64: 1, 16>}, {pipeline_mode = #tpu.pipeline_mode<synchronous>, transform_indices = @transform_12, window_bounds = array<i64: 16, 32>}, {pipeline_mode = #tpu.pipeline_mode<synchronous>, transform_indices = @transform_13, window_bounds = array<i64: 8, 32>}, {pipeline_mode = #tpu.pipeline_mode<synchronous>, transform_indices = @transform_14, window_bounds = array<i64: 8, 32>}, {pipeline_mode = #tpu.pipeline_mode<synchronous>, transform_indices = @transform_15, window_bounds = array<i64: 1, 32>}, {pipeline_mode = #tpu.pipeline_mode<synchronous>, transform_indices = @transform_16, window_bounds = array<i64: 8, 32>}, {transform_indices = @transform_17, window_bounds = array<i64: 1, 32, 96>}, {transform_indices = @transform_18, window_bounds = array<i64: 1, 1, 96>}, {transform_indices = @transform_19, window_bounds = array<i64: 1, 32, 32>}, {transform_indices = @transform_20, window_bounds = array<i64: 1, 1, 32>}, {transform_indices = @transform_21, window_bounds = array<i64: 1, 1, 32>}, {transform_indices = @transform_22, window_bounds = array<i64: 1, 1, 32>}, {transform_indices = @transform_23, window_bounds = array<i64: 1, 32, 64>}, {transform_indices = @transform_24, window_bounds = array<i64: 1, 1, 64>}, {transform_indices = @transform_25, window_bounds = array<i64: 1, 64, 32>}, {transform_indices = @transform_26, window_bounds = array<i64: 1, 1, 32>}, {transform_indices = @transform_27, window_bounds = array<i64: 1, 1, 32>}, {transform_indices = @transform_28, window_bounds = array<i64: 1, 1, 32>}, {pipeline_mode = #tpu.pipeline_mode<synchronous>, transform_indices = @transform_29, window_bounds = array<i64: 32, 32>}, {pipeline_mode = #tpu.pipeline_mode<synchronous>, transform_indices = @transform_30, window_bounds = array<i64: 1, 32>}, {transform_indices = @transform_31, window_bounds = array<i64: 1, 1, 64>}, {transform_indices = @transform_32, window_bounds = array<i64: 1, 1, 32>}]} {
    %c0_i32 = arith.constant 0 : i32
    %0 = arith.cmpi eq, %arg1, %c0_i32 : i32
    %1 = arith.extui %0 : i1 to i32
    %c0_i32_0 = arith.constant 0 : i32
    %2 = arith.cmpi ne, %1, %c0_i32_0 : i32
    scf.if %2 {
      %c0_61 = arith.constant 0 : index
      %c0_62 = arith.constant 0 : index
      %c0_63 = arith.constant 0 : index
      %134 = vector.load %arg2[%c0_61, %c0_62, %c0_63] : memref<1x8x16xf32, #tpu.memory_space<vmem>>, vector<1x8x16xf32>
      %135 = vector.shape_cast %134 : vector<1x8x16xf32> to vector<8x16xf32>
      %136 = arith.truncf %135 : vector<8x16xf32> to vector<8x16xbf16>
      %c0_64 = arith.constant 0 : index
      %c0_65 = arith.constant 0 : index
      %137 = vector.load %arg14[%c0_64, %c0_65] : memref<16x32xbf16, #tpu.memory_space<vmem>>, vector<16x32xbf16>
      %cst_66 = arith.constant dense<0.000000e+00> : vector<8x32xf32>
      %138 = tpu.matmul %136, %137, %cst_66 {dimension_numbers = #tpu.dot_dimension_numbers<[1], [0], [0], [1], [0, 0, 1, 1], [], []>} : vector<8x16xbf16>, vector<16x32xbf16>, vector<8x32xf32> -> vector<8x32xf32>
      %c0_67 = arith.constant 0 : index
      %c0_68 = arith.constant 0 : index
      %c0_69 = arith.constant 0 : index
      %139 = vector.load %arg3[%c0_67, %c0_68, %c0_69] : memref<1x8x8xf32, #tpu.memory_space<vmem>>, vector<1x8x8xf32>
      %140 = vector.shape_cast %139 : vector<1x8x8xf32> to vector<8x8xf32>
      %141 = arith.truncf %140 : vector<8x8xf32> to vector<8x8xbf16>
      %c0_70 = arith.constant 0 : index
      %c0_71 = arith.constant 0 : index
      %142 = vector.load %arg15[%c0_70, %c0_71] : memref<8x32xbf16, #tpu.memory_space<vmem>>, vector<8x32xbf16>
      %cst_72 = arith.constant dense<0.000000e+00> : vector<8x32xf32>
      %143 = tpu.matmul %141, %142, %cst_72 {dimension_numbers = #tpu.dot_dimension_numbers<[1], [0], [0], [1], [0, 0, 1, 1], [], []>} : vector<8x8xbf16>, vector<8x32xbf16>, vector<8x32xf32> -> vector<8x32xf32>
      %144 = arith.addf %138, %143 : vector<8x32xf32>
      %c0_73 = arith.constant 0 : index
      %c0_74 = arith.constant 0 : index
      %c0_75 = arith.constant 0 : index
      %145 = vector.load %arg4[%c0_73, %c0_74, %c0_75] : memref<1x8x8xf32, #tpu.memory_space<vmem>>, vector<1x8x8xf32>
      %146 = vector.shape_cast %145 : vector<1x8x8xf32> to vector<8x8xf32>
      %147 = arith.truncf %146 : vector<8x8xf32> to vector<8x8xbf16>
      %c0_76 = arith.constant 0 : index
      %c0_77 = arith.constant 0 : index
      %148 = vector.load %arg16[%c0_76, %c0_77] : memref<8x32xbf16, #tpu.memory_space<vmem>>, vector<8x32xbf16>
      %cst_78 = arith.constant dense<0.000000e+00> : vector<8x32xf32>
      %149 = tpu.matmul %147, %148, %cst_78 {dimension_numbers = #tpu.dot_dimension_numbers<[1], [0], [0], [1], [0, 0, 1, 1], [], []>} : vector<8x8xbf16>, vector<8x32xbf16>, vector<8x32xf32> -> vector<8x32xf32>
      %150 = arith.addf %144, %149 : vector<8x32xf32>
      %c0_79 = arith.constant 0 : index
      %c0_80 = arith.constant 0 : index
      %151 = vector.load %arg17[%c0_79, %c0_80] : memref<1x32xf32, #tpu.memory_space<vmem>>, vector<1x32xf32>
      %152 = vector.broadcast %151 : vector<1x32xf32> to vector<8x32xf32>
      %153 = arith.addf %150, %152 : vector<8x32xf32>
      %c0_81 = arith.constant 0 : index
      %c0_82 = arith.constant 0 : index
      %154 = vector.load %arg18[%c0_81, %c0_82] : memref<8x32xf32, #tpu.memory_space<vmem>>, vector<8x32xf32>
      %155 = arith.addf %153, %154 : vector<8x32xf32>
      %c0_83 = arith.constant 0 : index
      %c0_84 = arith.constant 0 : index
      %156 = vector.load %arg35[%c0_83, %c0_84] : memref<8x32xf32, #tpu.memory_space<vmem>>, vector<8x32xf32>
      tpu.vector_store %arg35[%c0_83, %c0_84], %155 {strides = array<i32>} : memref<8x32xf32, #tpu.memory_space<vmem>>, vector<8x32xf32>,
      %c0_85 = arith.constant 0 : index
      %c0_86 = arith.constant 0 : index
      %c0_87 = arith.constant 0 : index
      %157 = vector.load %arg5[%c0_85, %c0_86, %c0_87] : memref<1x1x128xf32, #tpu.memory_space<vmem>>, vector<1x1x128xf32>
      %158 = vector.shape_cast %157 : vector<1x1x128xf32> to vector<1x128xf32>
      %159 = arith.truncf %158 : vector<1x128xf32> to vector<1x128xbf16>
      %c0_88 = arith.constant 0 : index
      %c0_89 = arith.constant 0 : index
      %160 = vector.load %arg8[%c0_88, %c0_89] : memref<128x32xbf16, #tpu.memory_space<vmem>>, vector<128x32xbf16>
      %cst_90 = arith.constant dense<0.000000e+00> : vector<1x32xf32>
      %161 = tpu.matmul %159, %160, %cst_90 {dimension_numbers = #tpu.dot_dimension_numbers<[1], [0], [0], [1], [0, 0, 1, 1], [], []>} : vector<1x128xbf16>, vector<128x32xbf16>, vector<1x32xf32> -> vector<1x32xf32>
      %c0_91 = arith.constant 0 : index
      %c0_92 = arith.constant 0 : index
      %162 = vector.load %arg9[%c0_91, %c0_92] : memref<1x32xf32, #tpu.memory_space<vmem>>, vector<1x32xf32>
      %163 = arith.addf %161, %162 : vector<1x32xf32>
      %c0_93 = arith.constant 0 : index
      %c0_94 = arith.constant 0 : index
      %c0_95 = arith.constant 0 : index
      %164 = vector.load %arg6[%c0_93, %c0_94, %c0_95] : memref<1x1x64xf32, #tpu.memory_space<vmem>>, vector<1x1x64xf32>
      %165 = vector.shape_cast %164 : vector<1x1x64xf32> to vector<1x64xf32>
      %166 = arith.truncf %165 : vector<1x64xf32> to vector<1x64xbf16>
      %c0_96 = arith.constant 0 : index
      %c0_97 = arith.constant 0 : index
      %167 = vector.load %arg10[%c0_96, %c0_97] : memref<64x16xbf16, #tpu.memory_space<vmem>>, vector<64x16xbf16>
      %cst_98 = arith.constant dense<0.000000e+00> : vector<1x16xf32>
      %168 = tpu.matmul %166, %167, %cst_98 {dimension_numbers = #tpu.dot_dimension_numbers<[1], [0], [0], [1], [0, 0, 1, 1], [], []>} : vector<1x64xbf16>, vector<64x16xbf16>, vector<1x16xf32> -> vector<1x16xf32>
      %c0_99 = arith.constant 0 : index
      %c0_100 = arith.constant 0 : index
      %169 = vector.load %arg11[%c0_99, %c0_100] : memref<1x16xf32, #tpu.memory_space<vmem>>, vector<1x16xf32>
      %170 = arith.addf %168, %169 : vector<1x16xf32>
      %c0_101 = arith.constant 0 : index
      %c0_102 = arith.constant 0 : index
      %c0_103 = arith.constant 0 : index
      %171 = vector.load %arg7[%c0_101, %c0_102, %c0_103] : memref<1x1x64xf32, #tpu.memory_space<vmem>>, vector<1x1x64xf32>
      %172 = vector.shape_cast %171 : vector<1x1x64xf32> to vector<1x64xf32>
      %173 = arith.truncf %172 : vector<1x64xf32> to vector<1x64xbf16>
      %c0_104 = arith.constant 0 : index
      %c0_105 = arith.constant 0 : index
      %174 = vector.load %arg12[%c0_104, %c0_105] : memref<64x16xbf16, #tpu.memory_space<vmem>>, vector<64x16xbf16>
      %cst_106 = arith.constant dense<0.000000e+00> : vector<1x16xf32>
      %175 = tpu.matmul %173, %174, %cst_106 {dimension_numbers = #tpu.dot_dimension_numbers<[1], [0], [0], [1], [0, 0, 1, 1], [], []>} : vector<1x64xbf16>, vector<64x16xbf16>, vector<1x16xf32> -> vector<1x16xf32>
      %c0_107 = arith.constant 0 : index
      %c0_108 = arith.constant 0 : index
      %176 = vector.load %arg13[%c0_107, %c0_108] : memref<1x16xf32, #tpu.memory_space<vmem>>, vector<1x16xf32>
      %177 = arith.addf %175, %176 : vector<1x16xf32>
      %178 = tpu.concatenate %163, %170, %177 in 1 : vector<1x32xf32>, vector<1x16xf32>, vector<1x16xf32> -> vector<1x64xf32>
      %c0_109 = arith.constant 0 : index
      %c0_110 = arith.constant 0 : index
      %c0_111 = arith.constant 0 : index
      %179 = vector.load %arg33[%c0_109, %c0_110, %c0_111] : memref<1x1x64xf32, #tpu.memory_space<vmem>>, vector<1x1x64xf32>
      %180 = vector.shape_cast %179 : vector<1x1x64xf32> to vector<1x64xf32>
      %181 = vector.shape_cast %178 : vector<1x64xf32> to vector<1x1x64xf32>
      tpu.vector_store %arg33[%c0_109, %c0_110, %c0_111], %181 {strides = array<i32>} : memref<1x1x64xf32, #tpu.memory_space<vmem>>, vector<1x1x64xf32>,
    } else {
    }
    %c0 = arith.constant 0 : index
    %c0_1 = arith.constant 0 : index
    %3 = vector.load %arg35[%c0, %c0_1] : memref<8x32xf32, #tpu.memory_space<vmem>>, vector<8x32xf32>
    %4 = arith.truncf %3 : vector<8x32xf32> to vector<8x32xbf16>
    %c0_2 = arith.constant 0 : index
    %c0_3 = arith.constant 0 : index
    %c0_4 = arith.constant 0 : index
    %5 = vector.load %arg19[%c0_2, %c0_3, %c0_4] : memref<1x32x96xbf16, #tpu.memory_space<vmem>>, vector<1x32x96xbf16>
    %6 = vector.shape_cast %5 : vector<1x32x96xbf16> to vector<32x96xbf16>
    %cst = arith.constant dense<0.000000e+00> : vector<8x96xf32>
    %7 = tpu.matmul %4, %6, %cst {dimension_numbers = #tpu.dot_dimension_numbers<[1], [0], [0], [1], [0, 0, 1, 1], [], []>} : vector<8x32xbf16>, vector<32x96xbf16>, vector<8x96xf32> -> vector<8x96xf32>
    %c0_5 = arith.constant 0 : index
    %c0_6 = arith.constant 0 : index
    %c0_7 = arith.constant 0 : index
    %8 = vector.load %arg20[%c0_5, %c0_6, %c0_7] : memref<1x1x96xf32, #tpu.memory_space<vmem>>, vector<1x1x96xf32>
    %9 = vector.shape_cast %8 : vector<1x1x96xf32> to vector<1x96xf32>
    %10 = vector.broadcast %9 : vector<1x96xf32> to vector<8x96xf32>
    %11 = arith.addf %7, %10 : vector<8x96xf32>
    %12 = vector.extract_strided_slice %11 {offsets = [0, 0], sizes = [8, 16], strides = [1, 1]} : vector<8x96xf32> to vector<8x16xf32>
    %13 = vector.extract_strided_slice %11 {offsets = [0, 16], sizes = [8, 16], strides = [1, 1]} : vector<8x96xf32> to vector<8x16xf32>
    %14 = vector.shape_cast %12 : vector<8x16xf32> to vector<1x8x16xf32>
    %15 = vector.shape_cast %13 : vector<8x16xf32> to vector<1x8x16xf32>
    %16 = tpu.concatenate %14, %15 in 0 : vector<1x8x16xf32>, vector<1x8x16xf32> -> vector<2x8x16xf32>
    %17 = vector.extract_strided_slice %11 {offsets = [0, 32], sizes = [8, 16], strides = [1, 1]} : vector<8x96xf32> to vector<8x16xf32>
    %18 = vector.extract_strided_slice %11 {offsets = [0, 48], sizes = [8, 16], strides = [1, 1]} : vector<8x96xf32> to vector<8x16xf32>
    %19 = vector.shape_cast %17 : vector<8x16xf32> to vector<1x8x16xf32>
    %20 = vector.shape_cast %18 : vector<8x16xf32> to vector<1x8x16xf32>
    %21 = tpu.concatenate %19, %20 in 0 : vector<1x8x16xf32>, vector<1x8x16xf32> -> vector<2x8x16xf32>
    %22 = vector.extract_strided_slice %11 {offsets = [0, 64], sizes = [8, 16], strides = [1, 1]} : vector<8x96xf32> to vector<8x16xf32>
    %23 = vector.extract_strided_slice %11 {offsets = [0, 80], sizes = [8, 16], strides = [1, 1]} : vector<8x96xf32> to vector<8x16xf32>
    %24 = vector.shape_cast %22 : vector<8x16xf32> to vector<1x8x16xf32>
    %25 = vector.shape_cast %23 : vector<8x16xf32> to vector<1x8x16xf32>
    %26 = tpu.concatenate %24, %25 in 0 : vector<1x8x16xf32>, vector<1x8x16xf32> -> vector<2x8x16xf32>
    %27 = arith.truncf %16 : vector<2x8x16xf32> to vector<2x8x16xbf16>
    %28 = arith.truncf %21 : vector<2x8x16xf32> to vector<2x8x16xbf16>
    "tpu.trace_start"() <{level = 10 : i32, message = "hqd,hkd->hqk"}> : () -> ()
    %cst_8 = arith.constant dense<0.000000e+00> : vector<2x8x8xf32>
    %29 = tpu.matmul %27, %28, %cst_8 {dimension_numbers = #tpu.dot_dimension_numbers<[2], [2], [1], [1], [0, 0, 0, 1, 1, 1], [0], [0]>} : vector<2x8x16xbf16>, vector<2x8x16xbf16>, vector<2x8x8xf32> -> vector<2x8x8xf32>
    "tpu.trace_stop"() : () -> ()
    %cst_9 = arith.constant 2.500000e-01 : f32
    %30 = vector.broadcast %cst_9 : f32 to vector<2x8x8xf32>
    %31 = arith.mulf %29, %30 : vector<2x8x8xf32>
    %cst_10 = arith.constant dense<0xFF800000> : vector<2x8xf32>
    %32 = vector.multi_reduction <maximumf>, %31, %cst_10 [2] : vector<2x8x8xf32> to vector<2x8xf32>
    %33 = vector.shape_cast %32 : vector<2x8xf32> to vector<2x8x1xf32>
    %34 = vector.broadcast %33 : vector<2x8x1xf32> to vector<2x8x8xf32>
    %35 = arith.subf %31, %34 : vector<2x8x8xf32>
    %36 = math.exp %35 : vector<2x8x8xf32>
    %cst_11 = arith.constant dense<0.000000e+00> : vector<2x8xf32>
    %37 = vector.multi_reduction <add>, %36, %cst_11 [2] : vector<2x8x8xf32> to vector<2x8xf32>
    %38 = vector.shape_cast %37 : vector<2x8xf32> to vector<2x8x1xf32>
    %39 = tpu.reciprocal %38 {approx = true} : vector<2x8x1xf32> -> vector<2x8x1xf32>
    %40 = vector.broadcast %39 : vector<2x8x1xf32> to vector<2x8x8xf32>
    %41 = arith.mulf %36, %40 : vector<2x8x8xf32>
    %42 = arith.truncf %41 : vector<2x8x8xf32> to vector<2x8x8xbf16>
    %43 = arith.truncf %26 : vector<2x8x16xf32> to vector<2x8x16xbf16>
    "tpu.trace_start"() <{level = 10 : i32, message = "hqk,hkd->hqd"}> : () -> ()
    %cst_12 = arith.constant dense<0.000000e+00> : vector<2x8x16xf32>
    %44 = tpu.matmul %42, %43, %cst_12 {dimension_numbers = #tpu.dot_dimension_numbers<[2], [1], [1], [2], [0, 0, 0, 1, 1, 2], [0], [0]>} : vector<2x8x8xbf16>, vector<2x8x16xbf16>, vector<2x8x16xf32> -> vector<2x8x16xf32>
    "tpu.trace_stop"() : () -> ()
    %45 = vector.extract_strided_slice %44 {offsets = [0, 0, 0], sizes = [1, 8, 16], strides = [1, 1, 1]} : vector<2x8x16xf32> to vector<1x8x16xf32>
    %46 = vector.shape_cast %45 : vector<1x8x16xf32> to vector<8x16xf32>
    %47 = vector.extract_strided_slice %44 {offsets = [1, 0, 0], sizes = [1, 8, 16], strides = [1, 1, 1]} : vector<2x8x16xf32> to vector<1x8x16xf32>
    %48 = vector.shape_cast %47 : vector<1x8x16xf32> to vector<8x16xf32>
    %49 = tpu.concatenate %46, %48 in 1 : vector<8x16xf32>, vector<8x16xf32> -> vector<8x32xf32>
    %50 = arith.truncf %49 : vector<8x32xf32> to vector<8x32xbf16>
    %c0_13 = arith.constant 0 : index
    %c0_14 = arith.constant 0 : index
    %c0_15 = arith.constant 0 : index
    %51 = vector.load %arg21[%c0_13, %c0_14, %c0_15] : memref<1x32x32xbf16, #tpu.memory_space<vmem>>, vector<1x32x32xbf16>
    %52 = vector.shape_cast %51 : vector<1x32x32xbf16> to vector<32x32xbf16>
    %cst_16 = arith.constant dense<0.000000e+00> : vector<8x32xf32>
    %53 = tpu.matmul %50, %52, %cst_16 {dimension_numbers = #tpu.dot_dimension_numbers<[1], [0], [0], [1], [0, 0, 1, 1], [], []>} : vector<8x32xbf16>, vector<32x32xbf16>, vector<8x32xf32> -> vector<8x32xf32>
    %c0_17 = arith.constant 0 : index
    %c0_18 = arith.constant 0 : index
    %c0_19 = arith.constant 0 : index
    %54 = vector.load %arg22[%c0_17, %c0_18, %c0_19] : memref<1x1x32xf32, #tpu.memory_space<vmem>>, vector<1x1x32xf32>
    %55 = vector.shape_cast %54 : vector<1x1x32xf32> to vector<1x32xf32>
    %56 = vector.broadcast %55 : vector<1x32xf32> to vector<8x32xf32>
    %57 = arith.addf %53, %56 : vector<8x32xf32>
    %58 = arith.addf %3, %57 : vector<8x32xf32>
    %c0_20 = arith.constant 0 : index
    %c0_21 = arith.constant 0 : index
    %c0_22 = arith.constant 0 : index
    %59 = vector.load %arg23[%c0_20, %c0_21, %c0_22] : memref<1x1x32xf32, #tpu.memory_space<vmem>>, vector<1x1x32xf32>
    %60 = vector.shape_cast %59 : vector<1x1x32xf32> to vector<1x32xf32>
    %c0_23 = arith.constant 0 : index
    %c0_24 = arith.constant 0 : index
    %c0_25 = arith.constant 0 : index
    %61 = vector.load %arg24[%c0_23, %c0_24, %c0_25] : memref<1x1x32xf32, #tpu.memory_space<vmem>>, vector<1x1x32xf32>
    %62 = vector.shape_cast %61 : vector<1x1x32xf32> to vector<1x32xf32>
    %cst_26 = arith.constant dense<0.000000e+00> : vector<8xf32>
    %63 = vector.multi_reduction <add>, %58, %cst_26 [1] : vector<8x32xf32> to vector<8xf32>
    %64 = vector.shape_cast %63 : vector<8xf32> to vector<8x1xf32>
    %cst_27 = arith.constant 3.200000e+01 : f32
    %65 = vector.broadcast %cst_27 : f32 to vector<8x1xf32>
    %66 = arith.divf %64, %65 : vector<8x1xf32>
    %67 = vector.broadcast %66 : vector<8x1xf32> to vector<8x32xf32>
    %68 = arith.subf %58, %67 : vector<8x32xf32>
    %69 = arith.mulf %68, %68 : vector<8x32xf32>
    %cst_28 = arith.constant dense<0.000000e+00> : vector<8xf32>
    %70 = vector.multi_reduction <add>, %69, %cst_28 [1] : vector<8x32xf32> to vector<8xf32>
    %71 = vector.shape_cast %70 : vector<8xf32> to vector<8x1xf32>
    %cst_29 = arith.constant 3.200000e+01 : f32
    %72 = vector.broadcast %cst_29 : f32 to vector<8x1xf32>
    %73 = arith.divf %71, %72 : vector<8x1xf32>
    %74 = vector.broadcast %66 : vector<8x1xf32> to vector<8x32xf32>
    %75 = arith.subf %58, %74 : vector<8x32xf32>
    %cst_30 = arith.constant 9.99999974E-6 : f32
    %76 = vector.broadcast %cst_30 : f32 to vector<8x1xf32>
    %77 = arith.addf %73, %76 : vector<8x1xf32>
    %78 = math.rsqrt %77 : vector<8x1xf32>
    %79 = vector.broadcast %78 : vector<8x1xf32> to vector<8x32xf32>
    %80 = arith.mulf %75, %79 : vector<8x32xf32>
    %81 = vector.broadcast %60 : vector<1x32xf32> to vector<8x32xf32>
    %82 = arith.mulf %80, %81 : vector<8x32xf32>
    %83 = vector.broadcast %62 : vector<1x32xf32> to vector<8x32xf32>
    %84 = arith.addf %82, %83 : vector<8x32xf32>
    %85 = arith.truncf %84 : vector<8x32xf32> to vector<8x32xbf16>
    %c0_31 = arith.constant 0 : index
    %c0_32 = arith.constant 0 : index
    %c0_33 = arith.constant 0 : index
    %86 = vector.load %arg25[%c0_31, %c0_32, %c0_33] : memref<1x32x64xbf16, #tpu.memory_space<vmem>>, vector<1x32x64xbf16>
    %87 = vector.shape_cast %86 : vector<1x32x64xbf16> to vector<32x64xbf16>
    %cst_34 = arith.constant dense<0.000000e+00> : vector<8x64xf32>
    %88 = tpu.matmul %85, %87, %cst_34 {dimension_numbers = #tpu.dot_dimension_numbers<[1], [0], [0], [1], [0, 0, 1, 1], [], []>} : vector<8x32xbf16>, vector<32x64xbf16>, vector<8x64xf32> -> vector<8x64xf32>
    %c0_35 = arith.constant 0 : index
    %c0_36 = arith.constant 0 : index
    %c0_37 = arith.constant 0 : index
    %89 = vector.load %arg26[%c0_35, %c0_36, %c0_37] : memref<1x1x64xf32, #tpu.memory_space<vmem>>, vector<1x1x64xf32>
    %90 = vector.shape_cast %89 : vector<1x1x64xf32> to vector<1x64xf32>
    %91 = vector.broadcast %90 : vector<1x64xf32> to vector<8x64xf32>
    %92 = arith.addf %88, %91 : vector<8x64xf32>
    %cst_38 = arith.constant 0.000000e+00 : f32
    %93 = vector.broadcast %cst_38 : f32 to vector<8x64xf32>
    %94 = arith.maximumf %92, %93 : vector<8x64xf32>
    %95 = arith.truncf %94 : vector<8x64xf32> to vector<8x64xbf16>
    %c0_39 = arith.constant 0 : index
    %c0_40 = arith.constant 0 : index
    %c0_41 = arith.constant 0 : index
    %96 = vector.load %arg27[%c0_39, %c0_40, %c0_41] : memref<1x64x32xbf16, #tpu.memory_space<vmem>>, vector<1x64x32xbf16>
    %97 = vector.shape_cast %96 : vector<1x64x32xbf16> to vector<64x32xbf16>
    %cst_42 = arith.constant dense<0.000000e+00> : vector<8x32xf32>
    %98 = tpu.matmul %95, %97, %cst_42 {dimension_numbers = #tpu.dot_dimension_numbers<[1], [0], [0], [1], [0, 0, 1, 1], [], []>} : vector<8x64xbf16>, vector<64x32xbf16>, vector<8x32xf32> -> vector<8x32xf32>
    %c0_43 = arith.constant 0 : index
    %c0_44 = arith.constant 0 : index
    %c0_45 = arith.constant 0 : index
    %99 = vector.load %arg28[%c0_43, %c0_44, %c0_45] : memref<1x1x32xf32, #tpu.memory_space<vmem>>, vector<1x1x32xf32>
    %100 = vector.shape_cast %99 : vector<1x1x32xf32> to vector<1x32xf32>
    %101 = vector.broadcast %100 : vector<1x32xf32> to vector<8x32xf32>
    %102 = arith.addf %98, %101 : vector<8x32xf32>
    %103 = arith.addf %84, %102 : vector<8x32xf32>
    %c0_46 = arith.constant 0 : index
    %c0_47 = arith.constant 0 : index
    %c0_48 = arith.constant 0 : index
    %104 = vector.load %arg29[%c0_46, %c0_47, %c0_48] : memref<1x1x32xf32, #tpu.memory_space<vmem>>, vector<1x1x32xf32>
    %105 = vector.shape_cast %104 : vector<1x1x32xf32> to vector<1x32xf32>
    %c0_49 = arith.constant 0 : index
    %c0_50 = arith.constant 0 : index
    %c0_51 = arith.constant 0 : index
    %106 = vector.load %arg30[%c0_49, %c0_50, %c0_51] : memref<1x1x32xf32, #tpu.memory_space<vmem>>, vector<1x1x32xf32>
    %107 = vector.shape_cast %106 : vector<1x1x32xf32> to vector<1x32xf32>
    %cst_52 = arith.constant dense<0.000000e+00> : vector<8xf32>
    %108 = vector.multi_reduction <add>, %103, %cst_52 [1] : vector<8x32xf32> to vector<8xf32>
    %109 = vector.shape_cast %108 : vector<8xf32> to vector<8x1xf32>
    %cst_53 = arith.constant 3.200000e+01 : f32
    %110 = vector.broadcast %cst_53 : f32 to vector<8x1xf32>
    %111 = arith.divf %109, %110 : vector<8x1xf32>
    %112 = vector.broadcast %111 : vector<8x1xf32> to vector<8x32xf32>
    %113 = arith.subf %103, %112 : vector<8x32xf32>
    %114 = arith.mulf %113, %113 : vector<8x32xf32>
    %cst_54 = arith.constant dense<0.000000e+00> : vector<8xf32>
    %115 = vector.multi_reduction <add>, %114, %cst_54 [1] : vector<8x32xf32> to vector<8xf32>
    %116 = vector.shape_cast %115 : vector<8xf32> to vector<8x1xf32>
    %cst_55 = arith.constant 3.200000e+01 : f32
    %117 = vector.broadcast %cst_55 : f32 to vector<8x1xf32>
    %118 = arith.divf %116, %117 : vector<8x1xf32>
    %119 = vector.broadcast %111 : vector<8x1xf32> to vector<8x32xf32>
    %120 = arith.subf %103, %119 : vector<8x32xf32>
    %cst_56 = arith.constant 9.99999974E-6 : f32
    %121 = vector.broadcast %cst_56 : f32 to vector<8x1xf32>
    %122 = arith.addf %118, %121 : vector<8x1xf32>
    %123 = math.rsqrt %122 : vector<8x1xf32>
    %124 = vector.broadcast %123 : vector<8x1xf32> to vector<8x32xf32>
    %125 = arith.mulf %120, %124 : vector<8x32xf32>
    %126 = vector.broadcast %105 : vector<1x32xf32> to vector<8x32xf32>
    %127 = arith.mulf %125, %126 : vector<8x32xf32>
    %128 = vector.broadcast %107 : vector<1x32xf32> to vector<8x32xf32>
    %129 = arith.addf %127, %128 : vector<8x32xf32>
    %c0_57 = arith.constant 0 : index
    %c0_58 = arith.constant 0 : index
    %130 = vector.load %arg35[%c0_57, %c0_58] : memref<8x32xf32, #tpu.memory_space<vmem>>, vector<8x32xf32>
    tpu.vector_store %arg35[%c0_57, %c0_58], %129 {strides = array<i32>} : memref<8x32xf32, #tpu.memory_space<vmem>>, vector<8x32xf32>,
    %c0_i32_59 = arith.constant 0 : i32
    %131 = arith.cmpi eq, %arg1, %c0_i32_59 : i32
    %132 = arith.extui %131 : i1 to i32
    %c0_i32_60 = arith.constant 0 : i32
    %133 = arith.cmpi ne, %132, %c0_i32_60 : i32
    scf.if %133 {
      %cst_61 = arith.constant dense<0.000000e+00> : vector<32xf32>
      %134 = vector.multi_reduction <add>, %129, %cst_61 [0] : vector<8x32xf32> to vector<32xf32>
      %135 = vector.shape_cast %134 : vector<32xf32> to vector<1x32xf32>
      %cst_62 = arith.constant 8.000000e+00 : f32
      %136 = vector.broadcast %cst_62 : f32 to vector<1x32xf32>
      %137 = arith.divf %135, %136 : vector<1x32xf32>
      %138 = arith.truncf %137 : vector<1x32xf32> to vector<1x32xbf16>
      %c0_63 = arith.constant 0 : index
      %c0_64 = arith.constant 0 : index
      %139 = vector.load %arg31[%c0_63, %c0_64] : memref<32x32xbf16, #tpu.memory_space<vmem>>, vector<32x32xbf16>
      %cst_65 = arith.constant dense<0.000000e+00> : vector<1x32xf32>
      %140 = tpu.matmul %138, %139, %cst_65 {dimension_numbers = #tpu.dot_dimension_numbers<[1], [0], [0], [1], [0, 0, 1, 1], [], []>} : vector<1x32xbf16>, vector<32x32xbf16>, vector<1x32xf32> -> vector<1x32xf32>
      %c0_66 = arith.constant 0 : index
      %c0_67 = arith.constant 0 : index
      %141 = vector.load %arg32[%c0_66, %c0_67] : memref<1x32xf32, #tpu.memory_space<vmem>>, vector<1x32xf32>
      %142 = arith.addf %140, %141 : vector<1x32xf32>
      %c0_68 = arith.constant 0 : index
      %c0_69 = arith.constant 0 : index
      %c0_70 = arith.constant 0 : index
      %143 = vector.load %arg34[%c0_68, %c0_69, %c0_70] : memref<1x1x32xf32, #tpu.memory_space<vmem>>, vector<1x1x32xf32>
      %144 = vector.shape_cast %143 : vector<1x1x32xf32> to vector<1x32xf32>
      %145 = vector.shape_cast %142 : vector<1x32xf32> to vector<1x1x32xf32>
      tpu.vector_store %arg34[%c0_68, %c0_69, %c0_70], %145 {strides = array<i32>} : memref<1x1x32xf32, #tpu.memory_space<vmem>>, vector<1x1x32xf32>,
    } else {
    }
    return
  }
  func.func @transform_0(%arg0: i32, %arg1: i32) -> (i32, i32, i32) {
    %c0_i32 = arith.constant 0 : i32
    %c0_i32_0 = arith.constant 0 : i32
    %c0_i32_1 = arith.constant 0 : i32
    return %arg0, %c0_i32, %c0_i32_0 : i32, i32, i32
  }
  func.func @transform_1(%arg0: i32, %arg1: i32) -> (i32, i32, i32) {
    %c0_i32 = arith.constant 0 : i32
    %c0_i32_0 = arith.constant 0 : i32
    %c0_i32_1 = arith.constant 0 : i32
    return %arg0, %c0_i32, %c0_i32_0 : i32, i32, i32
  }
  func.func @transform_2(%arg0: i32, %arg1: i32) -> (i32, i32, i32) {
    %c0_i32 = arith.constant 0 : i32
    %c0_i32_0 = arith.constant 0 : i32
    %c0_i32_1 = arith.constant 0 : i32
    return %arg0, %c0_i32, %c0_i32_0 : i32, i32, i32
  }
  func.func @transform_3(%arg0: i32, %arg1: i32) -> (i32, i32, i32) {
    %c0_i32 = arith.constant 0 : i32
    %c0_i32_0 = arith.constant 0 : i32
    %c0_i32_1 = arith.constant 0 : i32
    return %arg0, %c0_i32, %c0_i32_0 : i32, i32, i32
  }
  func.func @transform_4(%arg0: i32, %arg1: i32) -> (i32, i32, i32) {
    %c0_i32 = arith.constant 0 : i32
    %c0_i32_0 = arith.constant 0 : i32
    %c0_i32_1 = arith.constant 0 : i32
    return %arg0, %c0_i32, %c0_i32_0 : i32, i32, i32
  }
  func.func @transform_5(%arg0: i32, %arg1: i32) -> (i32, i32, i32) {
    %c0_i32 = arith.constant 0 : i32
    %c0_i32_0 = arith.constant 0 : i32
    %c0_i32_1 = arith.constant 0 : i32
    return %arg0, %c0_i32, %c0_i32_0 : i32, i32, i32
  }
  func.func @transform_6(%arg0: i32, %arg1: i32) -> (i32, i32) {
    %c0_i32 = arith.constant 0 : i32
    %c0_i32_0 = arith.constant 0 : i32
    %c0_i32_1 = arith.constant 0 : i32
    return %c0_i32, %c0_i32_0 : i32, i32
  }
  func.func @transform_7(%arg0: i32, %arg1: i32) -> (i32, i32) {
    %c0_i32 = arith.constant 0 : i32
    %c0_i32_0 = arith.constant 0 : i32
    %c0_i32_1 = arith.constant 0 : i32
    return %c0_i32, %c0_i32_0 : i32, i32
  }
  func.func @transform_8(%arg0: i32, %arg1: i32) -> (i32, i32) {
    %c0_i32 = arith.constant 0 : i32
    %c0_i32_0 = arith.constant 0 : i32
    %c0_i32_1 = arith.constant 0 : i32
    return %c0_i32, %c0_i32_0 : i32, i32
  }
  func.func @transform_9(%arg0: i32, %arg1: i32) -> (i32, i32) {
    %c0_i32 = arith.constant 0 : i32
    %c0_i32_0 = arith.constant 0 : i32
    %c0_i32_1 = arith.constant 0 : i32
    return %c0_i32, %c0_i32_0 : i32, i32
  }
  func.func @transform_10(%arg0: i32, %arg1: i32) -> (i32, i32) {
    %c0_i32 = arith.constant 0 : i32
    %c0_i32_0 = arith.constant 0 : i32
    %c0_i32_1 = arith.constant 0 : i32
    return %c0_i32, %c0_i32_0 : i32, i32
  }
  func.func @transform_11(%arg0: i32, %arg1: i32) -> (i32, i32) {
    %c0_i32 = arith.constant 0 : i32
    %c0_i32_0 = arith.constant 0 : i32
    %c0_i32_1 = arith.constant 0 : i32
    return %c0_i32, %c0_i32_0 : i32, i32
  }
  func.func @transform_12(%arg0: i32, %arg1: i32) -> (i32, i32) {
    %c0_i32 = arith.constant 0 : i32
    %c0_i32_0 = arith.constant 0 : i32
    %c0_i32_1 = arith.constant 0 : i32
    return %c0_i32, %c0_i32_0 : i32, i32
  }
  func.func @transform_13(%arg0: i32, %arg1: i32) -> (i32, i32) {
    %c0_i32 = arith.constant 0 : i32
    %c0_i32_0 = arith.constant 0 : i32
    %c0_i32_1 = arith.constant 0 : i32
    return %c0_i32, %c0_i32_0 : i32, i32
  }
  func.func @transform_14(%arg0: i32, %arg1: i32) -> (i32, i32) {
    %c0_i32 = arith.constant 0 : i32
    %c0_i32_0 = arith.constant 0 : i32
    %c0_i32_1 = arith.constant 0 : i32
    return %c0_i32, %c0_i32_0 : i32, i32
  }
  func.func @transform_15(%arg0: i32, %arg1: i32) -> (i32, i32) {
    %c0_i32 = arith.constant 0 : i32
    %c0_i32_0 = arith.constant 0 : i32
    %c0_i32_1 = arith.constant 0 : i32
    return %c0_i32, %c0_i32_0 : i32, i32
  }
  func.func @transform_16(%arg0: i32, %arg1: i32) -> (i32, i32) {
    %c0_i32 = arith.constant 0 : i32
    %c0_i32_0 = arith.constant 0 : i32
    %c0_i32_1 = arith.constant 0 : i32
    return %c0_i32, %c0_i32_0 : i32, i32
  }
  func.func @transform_17(%arg0: i32, %arg1: i32) -> (i32, i32, i32) {
    %c0_i32 = arith.constant 0 : i32
    %c0_i32_0 = arith.constant 0 : i32
    %c0_i32_1 = arith.constant 0 : i32
    return %arg1, %c0_i32, %c0_i32_0 : i32, i32, i32
  }
  func.func @transform_18(%arg0: i32, %arg1: i32) -> (i32, i32, i32) {
    %c0_i32 = arith.constant 0 : i32
    %c0_i32_0 = arith.constant 0 : i32
    %c0_i32_1 = arith.constant 0 : i32
    return %arg1, %c0_i32, %c0_i32_0 : i32, i32, i32
  }
  func.func @transform_19(%arg0: i32, %arg1: i32) -> (i32, i32, i32) {
    %c0_i32 = arith.constant 0 : i32
    %c0_i32_0 = arith.constant 0 : i32
    %c0_i32_1 = arith.constant 0 : i32
    return %arg1, %c0_i32, %c0_i32_0 : i32, i32, i32
  }
  func.func @transform_20(%arg0: i32, %arg1: i32) -> (i32, i32, i32) {
    %c0_i32 = arith.constant 0 : i32
    %c0_i32_0 = arith.constant 0 : i32
    %c0_i32_1 = arith.constant 0 : i32
    return %arg1, %c0_i32, %c0_i32_0 : i32, i32, i32
  }
  func.func @transform_21(%arg0: i32, %arg1: i32) -> (i32, i32, i32) {
    %c0_i32 = arith.constant 0 : i32
    %c0_i32_0 = arith.constant 0 : i32
    %c0_i32_1 = arith.constant 0 : i32
    return %arg1, %c0_i32, %c0_i32_0 : i32, i32, i32
  }
  func.func @transform_22(%arg0: i32, %arg1: i32) -> (i32, i32, i32) {
    %c0_i32 = arith.constant 0 : i32
    %c0_i32_0 = arith.constant 0 : i32
    %c0_i32_1 = arith.constant 0 : i32
    return %arg1, %c0_i32, %c0_i32_0 : i32, i32, i32
  }
  func.func @transform_23(%arg0: i32, %arg1: i32) -> (i32, i32, i32) {
    %c0_i32 = arith.constant 0 : i32
    %c0_i32_0 = arith.constant 0 : i32
    %c0_i32_1 = arith.constant 0 : i32
    return %arg1, %c0_i32, %c0_i32_0 : i32, i32, i32
  }
  func.func @transform_24(%arg0: i32, %arg1: i32) -> (i32, i32, i32) {
    %c0_i32 = arith.constant 0 : i32
    %c0_i32_0 = arith.constant 0 : i32
    %c0_i32_1 = arith.constant 0 : i32
    return %arg1, %c0_i32, %c0_i32_0 : i32, i32, i32
  }
  func.func @transform_25(%arg0: i32, %arg1: i32) -> (i32, i32, i32) {
    %c0_i32 = arith.constant 0 : i32
    %c0_i32_0 = arith.constant 0 : i32
    %c0_i32_1 = arith.constant 0 : i32
    return %arg1, %c0_i32, %c0_i32_0 : i32, i32, i32
  }
  func.func @transform_26(%arg0: i32, %arg1: i32) -> (i32, i32, i32) {
    %c0_i32 = arith.constant 0 : i32
    %c0_i32_0 = arith.constant 0 : i32
    %c0_i32_1 = arith.constant 0 : i32
    return %arg1, %c0_i32, %c0_i32_0 : i32, i32, i32
  }
  func.func @transform_27(%arg0: i32, %arg1: i32) -> (i32, i32, i32) {
    %c0_i32 = arith.constant 0 : i32
    %c0_i32_0 = arith.constant 0 : i32
    %c0_i32_1 = arith.constant 0 : i32
    return %arg1, %c0_i32, %c0_i32_0 : i32, i32, i32
  }
  func.func @transform_28(%arg0: i32, %arg1: i32) -> (i32, i32, i32) {
    %c0_i32 = arith.constant 0 : i32
    %c0_i32_0 = arith.constant 0 : i32
    %c0_i32_1 = arith.constant 0 : i32
    return %arg1, %c0_i32, %c0_i32_0 : i32, i32, i32
  }
  func.func @transform_29(%arg0: i32, %arg1: i32) -> (i32, i32) {
    %c0_i32 = arith.constant 0 : i32
    %c0_i32_0 = arith.constant 0 : i32
    %c0_i32_1 = arith.constant 0 : i32
    return %c0_i32, %c0_i32_0 : i32, i32
  }
  func.func @transform_30(%arg0: i32, %arg1: i32) -> (i32, i32) {
    %c0_i32 = arith.constant 0 : i32
    %c0_i32_0 = arith.constant 0 : i32
    %c0_i32_1 = arith.constant 0 : i32
    return %c0_i32, %c0_i32_0 : i32, i32
  }
  func.func @transform_31(%arg0: i32, %arg1: i32) -> (i32, i32, i32) {
    %c0_i32 = arith.constant 0 : i32
    %c0_i32_0 = arith.constant 0 : i32
    %c0_i32_1 = arith.constant 0 : i32
    return %arg0, %c0_i32, %c0_i32_0 : i32, i32, i32
  }
  func.func @transform_32(%arg0: i32, %arg1: i32) -> (i32, i32, i32) {
    %c0_i32 = arith.constant 0 : i32
    %c0_i32_0 = arith.constant 0 : i32
    %c0_i32_1 = arith.constant 0 : i32
    return %arg0, %c0_i32, %c0_i32_0 : i32, i32, i32
  }
}

</mosaic_0001>

<bundles_post_ra>
// kernel: _lambda_.1
= control target key start
LH: loop header
LB: loop body
LE: loop exit
PB: predicated region body
PF: predicated region fallthrough
CT: control target
= control target key end

     0   :  { %s3577_s6 = smov 1   ;;  %s3578_s10 = smov 2   ;;  %s4201_s0 = inlined_call_operand.smem [shape: u32[33], index: -1, kind: input, shape index: {}] }
   0x1   :  { %s3635_s5 = sld [smem:[%s4201_s0]]   ;;  %s3579_s14 = smov 3  }
   0x2   :  { %s3640_s9 = sld [smem:[%s4201_s0 + %s3577_s6]]   ;;  %s3580_s18 = smov 4  }
   0x3   :  { %s3645_s13 = sld [smem:[%s4201_s0 + %s3578_s10]]   ;;  %s3581_s22 = smov 5  }
   0x4   :  { %s3650_s17 = sld [smem:[%s4201_s0 + %s3579_s14]]   ;;  %s3582_s26 = smov 6  }
   0x5   :  { %s3655_s21 = sld [smem:[%s4201_s0 + %s3580_s18]]   ;;  %s3583_s30 = smov 7  }
   0x6   :  { %s3660_s25 = sld [smem:[%s4201_s0 + %s3581_s22]]   ;;  %s3584_s4 = smov 8  }
   0x7   :  { %s3665_s29 = sld [smem:[%s4201_s0 + %s3582_s26]]   ;;  %s3585_s10 = smov 9  }
   0x8   :  { %s3670_s3 = sld [smem:[%s4201_s0 + %s3583_s30]]   ;;  %s3586_s15 = smov 10  }
   0x9   :  { %s3675_s8 = sld [smem:[%s4201_s0 + %s3584_s4]]   ;;  %s3587_s20 = smov 11  }
   0xa   :  { %s3680_s14 = sld [smem:[%s4201_s0 + %s3585_s10]]   ;;  %s3588_s26 = smov 12  }
   0xb   :  { %4219 = sst [smem:[#allocation21_spill]] %s3655_s21  ;;  %s3589_s1 = smov 13  }
   0xc   :  { %4220 = sst [smem:[#allocation22_spill]] %s3660_s25  ;;  %s3590_s7 = smov 14  }
   0xd   :  { %s3685_s19 = sld [smem:[%s4201_s0 + %s3586_s15]]   ;;  %s3591_s15 = smov 15  }
   0xe   :  { %4221 = sst [smem:[#allocation23_spill]] %s3670_s3  ;;  %s3592_s22 = smov 16  }
   0xf   :  { %s3690_s24 = sld [smem:[%s4201_s0 + %s3587_s20]]   ;;  %s3593_s28 = smov 17  }
  0x10   :  { %4222 = sst [smem:[#allocation24_spill]] %s3680_s14 }
  0x11   :  { %s3695_s30 = sld [smem:[%s4201_s0 + %s3588_s26]]  }
  0x12   :  { %s3700_s6 = sld [smem:[%s4201_s0 + %s3589_s1]]  }
  0x13   :  { %4223 = sst [smem:[#allocation25_spill]] %s3685_s19 }
  0x14   :  { %s3705_s12 = sld [smem:[%s4201_s0 + %s3590_s7]]   ;;  %s3594_s7 = smov 18  }
  0x15   :  { %4224 = sst [smem:[#allocation26_spill]] %s3690_s24 }
  0x16   :  { %s3710_s20 = sld [smem:[%s4201_s0 + %s3591_s15]]   ;;  %s3595_s15 = smov 19  }
  0x17   :  { %s3715_s27 = sld [smem:[%s4201_s0 + %s3592_s22]]   ;;  %s3596_s22 = smov 20  }
  0x18   :  { %s3720_s4 = sld [smem:[%s4201_s0 + %s3593_s28]]   ;;  %s3597_s28 = smov 21  }
  0x19   :  { %s3725_s3 = sld [smem:[%s4201_s0 + %s3594_s7]]   ;;  %s3598_s7 = smov 22  }
  0x1a   :  { %s3730_s24 = sld [smem:[%s4201_s0 + %s3595_s15]]   ;;  %s3599_s15 = smov 23  }
  0x1b   :  { %s3735_s14 = sld [smem:[%s4201_s0 + %s3596_s22]]   ;;  %s3600_s22 = smov 24  }
  0x1c   :  { %4225 = sst [smem:[#allocation27_spill]] %s3710_s20 }
  0x1d   :  { %4226 = sst [smem:[#allocation28_spill]] %s3715_s27 }
  0x1e   :  { %s3740_s25 = sld [smem:[%s4201_s0 + %s3597_s28]]   ;;  %s3601_s28 = smov 25  }
  0x1f   :  { %4227 = sst [smem:[#allocation29_spill]] %s3725_s3 }
  0x20   :  { %s3745_s3 = sld [smem:[%s4201_s0 + %s3598_s7]]   ;;  %s3602_s7 = smov 26  }
  0x21   :  { %4228 = sst [smem:[#allocation30_spill]] %s3735_s14 }
  0x22   :  { %s3750_s21 = sld [smem:[%s4201_s0 + %s3599_s15]]   ;;  %s3603_s15 = smov 27  }
  0x23   :  { %s3755_s14 = sld [smem:[%s4201_s0 + %s3600_s22]]   ;;  %s3604_s22 = smov 28  }
  0x24   :  { %4229 = sst [smem:[#allocation31_spill]] %s3740_s25 }
  0x25   :  { %s3760_s25 = sld [smem:[%s4201_s0 + %s3601_s28]]   ;;  %s3605_s28 = smov 29  }
  0x26   :  { %4230 = sst [smem:[#allocation32_spill]] %s3745_s3 }
  0x27   :  { %s3765_s3 = sld [smem:[%s4201_s0 + %s3602_s7]]   ;;  %s3606_s7 = smov 30  }
  0x28   :  { %s3770_s20 = sld [smem:[%s4201_s0 + %s3603_s15]]   ;;  %s3607_s15 = smov 31  }
  0x29   :  { %4231 = sst [smem:[#allocation33_spill]] %s3755_s14 }
  0x2a   :  { %s3775_s14 = sld [smem:[%s4201_s0 + %s3604_s22]]   ;;  %s3608_s22 = smov 32  }
  0x2b   :  { %4232 = sst [smem:[#allocation34_spill]] %s3760_s25 }
  0x2c   :  { %s3780_s25 = sld [smem:[%s4201_s0 + %s3605_s28]]  }
  0x2d   :  { %4233 = sst [smem:[#allocation35_spill]] %s3765_s3 }
  0x2e   :  { %4234 = sst [smem:[#allocation36_spill]] %s3770_s20 }
  0x2f   :  { %s3785_s3 = sld [smem:[%s4201_s0 + %s3606_s7]]  }
  0x30   :  { %4235 = sst [smem:[#allocation37_spill]] %s3775_s14 }
  0x31   :  { %s3790_s20 = sld [smem:[%s4201_s0 + %s3607_s15]]  }
  0x32   :  { %s3795_s14 = sld [smem:[%s4201_s0 + %s3608_s22]]  }
  0x38   :  { %4236 = sst [smem:[#allocation38_spill]] %s3795_s14 }
  0x39   :  { %71 = vsyncpa [#allocation4], 0 }
  0x3a   :  { %72 = vsyncpa [#allocation7], 0 }
  0x3b   :  { %73 = vsyncpa [#allocation10], 0 }
  0x3c   :  { %74 = vsyncpa [#allocation13], 0 }
  0x3d   :  { %75 = vsyncpa [#allocation5], 0 }
  0x3e   :  { %77 = vsyncpa [#allocation5 + $0x1], 0  ;;  %s3797_s28 = smov 0   ;;  %s3799_s1 = smov 0  }
  0x3f   :  { %s3801_s2 = smov 0   ;;  %s3803_s7 = smov 0  }
  0x40   :  { %s3805_s10 = smov 0   ;;  %s3807_s11 = smov 0  }
  0x41 LB: > { %s4237_s27 = sld [smem:[#allocation28_spill]]  ;;  %s4238_s19 = sld [smem:[#allocation25_spill]]  ;;  %s3559_s1 = sphi %s3799_s1, %s4282_s1   ;;  %s3555_s28 = sphi %s3797_s28, %s4281_s28   ;;  %s3575_s11 = sphi %s3807_s11, %s83_s11   ;;  %s3571_s10 = sphi %s3805_s10, %s4280_s10   ;;  %s3567_s7 = sphi %s3803_s7, %s4279_s7   ;;  %s3563_s2 = sphi %s3801_s2, %s4278_s2  }
  0x42   : > { %4239 = sst [smem:[#allocation39_spill]] %s3555_s28  ;;  %s2810_s0 = sadd.s32 4294967295, %s3575_s11  }
  0x43   : > { %4240 = sst [smem:[#allocation40_spill]] %s3563_s2  ;;  %s2811_s15 = sadd.s32 4294967294, %s3575_s11  }
  0x44   : > { %4241 = sst [smem:[#allocation41_spill]] %s3571_s10  ;;  %s95_s16 = sadd.s32 1, %s3571_s10 }
  0x45   : > { %4242 = sst [smem:[#allocation42_spill]] %s3575_s11  ;;  %s869_s18 = sadd.s32 1, %s3563_s2 }
  0x46   : > { %p97_p0 = scmp.ge.s32.totalorder %s95_s16, 2  ;;  %p879_p1 = scmp.ne.s32.totalorder %s3563_s2, %s3559_s1 }
  0x47   : > { %p880_p2 = scmp.eq.s32.totalorder %s2810_s0, 1  ;;  %p885_p3 = scmp.ne.s32.totalorder %s3559_s1, %s3555_s28 }
  0x48   : > { %s4284_s16 = smov (%p97_p0, %s95_s16), 0  ;;  %p886_p5 = scmp.eq.s32.totalorder %s2811_s15, 1 }
  0x49   : > { %4243 = sst [smem:[#allocation43_spill]] %s4284_s16  ;;  %p3837_p4 = por %p880_p2, %p879_p1 }
  0x4a   : > { %s866_s23 = ssub.s32 %s3571_s10, %s4284_s16  ;;  %p2812_p6 = scmp.ge.s32.totalorder %s3575_s11, 1 }
  0x4b   : > { %s4244_s22 = scalar_select %p3837_p4, 1, 0 }
  0x4c   : > { %p867_p7 = scmp.eq.s32.totalorder %s866_s23, 0  ;;  %p3844_p8 = por %p886_p5, %p885_p3 }
  0x4d   : > { %p893_p9 = scmp.lt.s32.totalorder %s3575_s11, 3  ;;  %p3856_p11 = scmp.eq.s32.totalorder %s2810_s0, 0 }
  0x4e   : > { %s4245_s26 = scalar_select %p3844_p8, 1, 0 }
  0x4f   : > { %s3850_s14 = scalar_select %p867_p7, %s3563_s2, %s869_s18  }
  0x50   : > { %4246 = sst [smem:[#allocation44_spill]] %s4245_s26  ;;  %p3852_p10 = pnand %p2812_p6, %p893_p9 }
  0x51   : > { %4247 = sst [smem:[#allocation45_spill]] %s3850_s14  ;;  %s3609_s23 = smov [#allocation6]  }
  0x52   : > { %s4248_s28 = scalar_select %p3852_p10, 1, 0 }
  0x53   : > { %s4249_s15 = scalar_select %p3856_p11, 1, 0 }
  0x54   : > { %p3106_p12 = pneg %p3852_p10  ;;  %s927_s16 = sshll.u32 %s3609_s23, 4  ;;  %s928_s16 = int_to_ptr.vmem [resolvable:$true] %s927_s16 }
  0x55   : > { %s3610_s18 = smov [#allocation9]   ;;  %s3285_s0 = scalar_lea.hbm %s4238_s19, 512 }
  0x56   : > { %p3864_p13 = pnand %p3856_p11, %p3106_p12  ;;  %s964_s14 = sshll.u32 %s3610_s18, 4  ;;  %s3868_s14 = int_to_ptr.vmem [resolvable:$true] %s964_s14 }
  0x57   : > { %p3286_p0 = scmp.ne.s32.totalorder %s4238_s19, %s3285_s0  ;;  %p3292_p5 = scmp.lt.u32.totalorder %s3285_s0, %s4238_s19 }
  0x58   : > { %p3874_p1 = pneg %p3864_p13 }
  0x5a   : > { %p3288_p2 = pnand %p3874_p1, %p3286_p0 }
  0x5c   : > { %p3289_p3 = pneg %p3288_p2 }
  0x5e   : > { %p3294_p6 = pnand %p3292_p5, %p3289_p3 }
  0x60   : > { %3297 = shalt.err (!%p3294_p6)
}
  0x61   : > { %s3298_s23 = scalar_lea.vmem %s928_s16, 512  ;;  %p3306_p8 = scmp.lt.s32.totalorder %s928_s16, %s928_s16 }
  0x62   : > { %p3299_p7 = scmp.ne.s32.totalorder %s928_s16, %s3298_s23  ;;  %p3307_p4 = scmp.lt.s32.totalorder %s3298_s23, %s3298_s23 }
  0x64   : > { %p3301_p9 = pnand %p3299_p7, %p3874_p1  ;;  %p3308_p11 = por %p3307_p4, %p3306_p8 }
  0x66   : > { %p3302_p12 = pneg %p3301_p9 }
  0x68   : > { %p3309_p10 = pnand %p3308_p11, %p3302_p12 }
  0x6a   : > { %3312 = shalt.err (!%p3309_p10)
}
  0x6b   : > { %s4213_s18 = smov 64   ;;  %s3612_s0 = smov 4  }
  0x6c   : > { %3112 = dma.hbm_to_vmem [thread:$0]  (!%p3864_p13), %s4238_s19, 512, %s928_s16, [#allocation7], %s4213_s18, %s4213_s18, %s3612_s0  }
  0x6d   : > { %s3313_s26 = scalar_lea.hbm %s4237_s27, 128 }
  0x6e   : > { %p3314_p0 = scmp.ne.s32.totalorder %s4237_s27, %s3313_s26  ;;  %p3320_p8 = scmp.lt.u32.totalorder %s3313_s26, %s4237_s27 }
  0x70   : > { %p3316_p2 = pnand %p3314_p0, %p3874_p1 }
  0x72   : > { %p3317_p4 = pneg %p3316_p2 }
  0x74   : > { %p3322_p10 = pnand %p3320_p8, %p3317_p4 }
  0x76   : > { %3325 = shalt.err (!%p3322_p10)
}
  0x77   : > { %s3326_s23 = scalar_lea.vmem %s3868_s14, 128  ;;  %p3334_p6 = scmp.lt.s32.totalorder %s3868_s14, %s3868_s14 }
  0x78   : > { %p3327_p11 = scmp.ne.s32.totalorder %s3868_s14, %s3326_s23  ;;  %p3335_p7 = scmp.lt.s32.totalorder %s3326_s23, %s3326_s23 }
  0x7a   : > { %p3329_p3 = pnand %p3327_p11, %p3874_p1  ;;  %p3336_p9 = por %p3335_p7, %p3334_p6 }
  0x7c   : > { %p3330_p5 = pneg %p3329_p3 }
  0x7e   : > { %p3337_p12 = pnand %p3336_p9, %p3330_p5 }
  0x80   : > { %3340 = shalt.err (!%p3337_p12)
}
  0x81   : > { %3118 = dma.hbm_to_vmem [thread:$0]  (!%p3864_p13), %s4237_s27, 128, %s3868_s14, [#allocation10]  }
  0x82   : > { %s3613_s16 = smov [#allocation12]   ;;  %s3341_s18 = scalar_lea.hbm %s3730_s24, 256 }
  0x83   : > { %s999_s26 = sshll.u32 %s3613_s16, 4  ;;  %p3342_p0 = scmp.ne.s32.totalorder %s3730_s24, %s3341_s18  ;;  %s1000_s26 = int_to_ptr.vmem [resolvable:$true] %s999_s26 }
  0x84   : > { %p3348_p8 = scmp.lt.u32.totalorder %s3341_s18, %s3730_s24 }
  0x85   : > { %p3344_p2 = pnand %p3342_p0, %p3874_p1 }
  0x87   : > { %p3345_p4 = pneg %p3344_p2 }
  0x89   : > { %p3350_p10 = pnand %p3348_p8, %p3345_p4 }
  0x8b   : > { %3353 = shalt.err (!%p3350_p10)
}
  0x8c   : > { %s3354_s23 = scalar_lea.vmem %s1000_s26, 256  ;;  %p3362_p6 = scmp.lt.s32.totalorder %s1000_s26, %s1000_s26 }
  0x8d   : > { %p3355_p11 = scmp.ne.s32.totalorder %s1000_s26, %s3354_s23  ;;  %p3363_p7 = scmp.lt.s32.totalorder %s3354_s23, %s3354_s23 }
  0x8f   : > { %p3357_p3 = pnand %p3355_p11, %p3874_p1  ;;  %p3364_p9 = por %p3363_p7, %p3362_p6 }
  0x91   : > { %p3358_p5 = pneg %p3357_p3 }
  0x93   : > { %p3365_p12 = pnand %p3364_p9, %p3358_p5 }
  0x95   : > { %3368 = shalt.err (!%p3365_p12)
}
  0x96   : > { %s4252_s14 = smov 64   ;;  %s3614_s18 = smov [#allocation3]  }
  0x97   : > { %3124 = dma.hbm_to_vmem [thread:$0]  (!%p3864_p13), %s3730_s24, 256, %s1000_s26, [#allocation13], %s4252_s14, %s4252_s14, %s3612_s0  }
  0x98   : > { %s911_s16 = sshll.u32 %s3614_s18, 4  ;;  %s3615_s19 = smov [#allocation8]   ;;  %s912_s16 = int_to_ptr.vmem [resolvable:$true] %s911_s16 }
  0x99   : > { %s947_s27 = sshll.u32 %s3615_s19, 4  ;;  %s3369_s23 = scalar_lea.hbm %s3675_s8, 512  ;;  %s3917_s27 = int_to_ptr.vmem [resolvable:$true] %s947_s27 }
  0x9a   : > { %p3370_p0 = scmp.ne.s32.totalorder %s3675_s8, %s3369_s23  ;;  %p3376_p8 = scmp.lt.u32.totalorder %s3369_s23, %s3675_s8 }
  0x9c   : > { %p3372_p2 = pnand %p3370_p0, %p3874_p1 }
  0x9e   : > { %p3373_p4 = pneg %p3372_p2 }
  0xa0   : > { %p3378_p10 = pnand %p3376_p8, %p3373_p4 }
  0xa2   : > { %3381 = shalt.err (!%p3378_p10)
}
  0xa3   : > { %s3382_s11 = scalar_lea.vmem %s912_s16, 512  ;;  %p3390_p6 = scmp.lt.s32.totalorder %s912_s16, %s912_s16 }
  0xa4   : > { %p3383_p11 = scmp.ne.s32.totalorder %s912_s16, %s3382_s11  ;;  %p3391_p7 = scmp.lt.s32.totalorder %s3382_s11, %s3382_s11 }
  0xa6   : > { %p3385_p3 = pnand %p3383_p11, %p3874_p1  ;;  %p3392_p9 = por %p3391_p7, %p3390_p6 }
  0xa8   : > { %p3386_p5 = pneg %p3385_p3 }
  0xaa   : > { %p3393_p12 = pnand %p3392_p9, %p3386_p5 }
  0xac   : > { %3396 = shalt.err (!%p3393_p12)
}
  0xad   : > { %3109 = dma.hbm_to_vmem [thread:$0]  (!%p3864_p13), %s3675_s8, 512, %s912_s16, [#allocation4], %s4252_s14, %s4252_s14, %s3612_s0  }
  0xae   : > { %s3397_s19 = scalar_lea.hbm %s3700_s6, 64 }
  0xaf   : > { %p3398_p0 = scmp.ne.s32.totalorder %s3700_s6, %s3397_s19  ;;  %p3404_p8 = scmp.lt.u32.totalorder %s3397_s19, %s3700_s6 }
  0xb1   : > { %p3400_p2 = pnand %p3398_p0, %p3874_p1 }
  0xb3   : > { %p3401_p4 = pneg %p3400_p2 }
  0xb5   : > { %p3406_p10 = pnand %p3404_p8, %p3401_p4 }
  0xb7   : > { %3409 = shalt.err (!%p3406_p10)
}
  0xb8   : > { %s3410_s11 = scalar_lea.vmem %s3917_s27, 64  ;;  %p3418_p6 = scmp.lt.s32.totalorder %s3917_s27, %s3917_s27 }
  0xb9   : > { %p3411_p11 = scmp.ne.s32.totalorder %s3917_s27, %s3410_s11  ;;  %p3419_p7 = scmp.lt.s32.totalorder %s3410_s11, %s3410_s11 }
  0xbb   : > { %p3413_p3 = pnand %p3411_p11, %p3874_p1  ;;  %p3420_p9 = por %p3419_p7, %p3418_p6 }
  0xbd   : > { %p3414_p5 = pneg %p3413_p3 }
  0xbf   : > { %p3421_p12 = pnand %p3420_p9, %p3414_p5 }
  0xc1   : > { %3424 = shalt.err (!%p3421_p12)
}
  0xc2   : > { %3115 = dma.hbm_to_vmem [thread:$0]  (!%p3864_p13), %s3700_s6, 64, %s3917_s27, [#allocation7]  }
  0xc3   : > { %s3616_s26 = smov [#allocation11]   ;;  %s3617_s16 = smov [#allocation14]  }
  0xc4   : > { %s977_s18 = sshll.u32 %s3616_s26, 4  ;;  %s1033_s23 = sshll.u32 %s3617_s16, 4  ;;  %s978_s18 = int_to_ptr.vmem [resolvable:$true] %s977_s18  ;;  %s3947_s23 = int_to_ptr.vmem [resolvable:$true] %s1033_s23 }
  0xc5   : > { %s3425_s19 = scalar_lea.hbm %s3720_s4, 256 }
  0xc6   : > { %p3426_p0 = scmp.ne.s32.totalorder %s3720_s4, %s3425_s19  ;;  %p3432_p8 = scmp.lt.u32.totalorder %s3425_s19, %s3720_s4 }
  0xc8   : > { %p3428_p2 = pnand %p3426_p0, %p3874_p1 }
  0xca   : > { %p3429_p4 = pneg %p3428_p2 }
  0xcc   : > { %p3434_p10 = pnand %p3432_p8, %p3429_p4 }
  0xce   : > { %3437 = shalt.err (!%p3434_p10)
}
  0xcf   : > { %s3438_s11 = scalar_lea.vmem %s978_s18, 256  ;;  %p3446_p6 = scmp.lt.s32.totalorder %s978_s18, %s978_s18 }
  0xd0   : > { %p3439_p11 = scmp.ne.s32.totalorder %s978_s18, %s3438_s11  ;;  %p3447_p7 = scmp.lt.s32.totalorder %s3438_s11, %s3438_s11 }
  0xd2   : > { %p3441_p3 = pnand %p3439_p11, %p3874_p1  ;;  %p3448_p9 = por %p3447_p7, %p3446_p6 }
  0xd4   : > { %p3442_p5 = pneg %p3441_p3 }
  0xd6   : > { %p3449_p12 = pnand %p3448_p9, %p3442_p5 }
  0xd8   : > { %3452 = shalt.err (!%p3449_p12)
}
  0xd9   : > { %3121 = dma.hbm_to_vmem [thread:$0]  (!%p3864_p13), %s3720_s4, 256, %s978_s18, [#allocation10], %s4252_s14, %s4252_s14, %s3612_s0  }
  0xda   : > { %s3453_s27 = scalar_lea.hbm %s3750_s21, 256 }
  0xdb   : > { %p3454_p0 = scmp.ne.s32.totalorder %s3750_s21, %s3453_s27  ;;  %p3460_p8 = scmp.lt.u32.totalorder %s3453_s27, %s3750_s21 }
  0xdd   : > { %p3456_p2 = pnand %p3454_p0, %p3874_p1 }
  0xdf   : > { %p3457_p4 = pneg %p3456_p2 }
  0xe1   : > { %p3462_p10 = pnand %p3460_p8, %p3457_p4 }
  0xe3   : > { %3465 = shalt.err (!%p3462_p10)
}
  0xe4   : > { %s3466_s26 = scalar_lea.vmem %s3947_s23, 256  ;;  %p3474_p6 = scmp.lt.s32.totalorder %s3947_s23, %s3947_s23 }
  0xe5   : > { %p3467_p11 = scmp.ne.s32.totalorder %s3947_s23, %s3466_s26  ;;  %p3475_p7 = scmp.lt.s32.totalorder %s3466_s26, %s3466_s26 }
  0xe7   : > { %p3469_p3 = pnand %p3467_p11, %p3874_p1  ;;  %p3476_p9 = por %p3475_p7, %p3474_p6 }
  0xe9   : > { %p3470_p5 = pneg %p3469_p3 }
  0xeb   : > { %p3477_p12 = pnand %p3476_p9, %p3470_p5 }
  0xed   : > { %3480 = shalt.err (!%p3477_p12)
}
  0xee   : > { %3127 = dma.hbm_to_vmem [thread:$0]  (!%p3864_p13), %s3750_s21, 256, %s3947_s23, [#allocation13], %s4252_s14, %s4252_s14, %s3612_s0  }
  0xef   : > { %p4253_p0 = scmp.ne.s32.totalorder %s4248_s28, 0 }
  0xf0   : > { %p4254_p1 = scmp.ne.s32.totalorder (!%p4253_p0), %s4249_s15, 0 }
  0xf1   : > { %1126 = sbr.rel (%p4253_p0) target bundleno = 3337 (0xd09), region = 144 }
  0xf8   : > { %3534 = dma.done.wait (%p4254_p1), [#allocation4], 512  }
  0xf9   : > { %3536 = vsyncadd (%p4254_p1), [#allocation4], 4294966784 }
  0xfa   : > { %3538 = dma.done.wait (%p4254_p1), [#allocation7], 576  }
  0xfb   : > { %3540 = vsyncadd (%p4254_p1), [#allocation7], 4294966720 }
  0xfc   : > { %3542 = dma.done.wait (%p4254_p1), [#allocation10], 384  }
  0xfd   : > { %3544 = vsyncadd (%p4254_p1), [#allocation10], 4294966912 }
  0xfe   : > { %3546 = dma.done.wait (%p4254_p1), [#allocation13], 512  }
  0xff   : > { %3548 = vsyncadd (%p4254_p1), [#allocation13], 4294966784  ;;  %p1279_p13 = scmp.lt.s32.totalorder %s3567_s7, 1  ;;  %v3618_v0 = vmov 0.0   ;;  %vm3619_vm0 = vmmov 0   ;;  %vm1348_vm1 = vcmask 1043456  }
 0x100   : > { %2946 = vmatprep.subr.bf16.mxu0 %v3618_v0  ;;  %2952 = vmatprep.subr.bf16.mxu1 %v3618_v0  ;;  %v1343_v1 = vld [vmem:[#allocation8] sm:$0xf]  ;;  %v3244_v3 = vld [vmem:[%s3695_s30] sm:$0xff]   ;;  %vm1344_vm2 = vcmask 64512   ;;  %vm1398_vm3 = vcmask 130048   ;;  %v3247_v14 = vld [vmem:[%s3665_s29 + $0x10] sm:$0xff]  }
 0x101   : > { %2948 = vmatprep.mubr.msk.bf16.mxu0 %vm3619_vm0, %v3618_v0  ;;  %s4004_s28 = scalar_select %p1279_p13, %s3567_s7, 1  ;;  %2954 = vmatprep.mubr.msk.bf16.mxu1 %vm3619_vm0, %v3618_v0  ;;  %v1350_v2 = vsel %vm1348_vm1, %v1343_v1, 0  ;;  %v1444_v8 = vld [vmem:[%s3705_s12] sm:$0xf]  ;;  %v3246_v12 = vld [vmem:[%s3665_s29 + $0x8] sm:$0xff]   ;;  %v3248_v15 = vld [vmem:[%s3665_s29 + $0x18] sm:$0xff]  }
 0x102   : > { %2947 = vmatpush3.bf16.msra.mxu0 %v1350_v2  ;;  %2953 = vmatpush3.bf16.msra.mxu1 %v3244_v3  ;;  %v1449_v9 = vsel %vm1348_vm1, %v1444_v8, 0  ;;  %v3245_v10 = vld [vmem:[%s3665_s29] sm:$0xff]   ;;  %v3250_v17 = vld [vmem:[%s3665_s29 + $0x28] sm:$0xff]   ;;  %v3251_v18 = vld [vmem:[%s3665_s29 + $0x30] sm:$0xff]   ;;  %s4255_s18 = sld [smem:[#allocation27_spill]]  ;;  %vm1502_vm4 = vcmask 261120  }
 0x103   : > { %s2838_s2 = sshll.u32 %s4004_s28, 3  ;;  %2958 = vmatprep.subr.bf16.mxu0 %v3618_v0  ;;  %2964 = vmatprep.subr.bf16.mxu1 %v3618_v0  ;;  %v3249_v16 = vld [vmem:[%s3665_s29 + $0x20] sm:$0xff]   ;;  %v3252_v19 = vld [vmem:[%s3665_s29 + $0x38] sm:$0xff]   ;;  %s1293_s14 = scalar_lea.vmem %s3650_s17, %s4004_s28  ;;  %v1500_v37 = vld [vmem:[#allocation9] sm:$0xff]  ;;  %vm1646_vm5 = vcmask 523264   ;;  %vm1777_vm6 = vcmask 392192  }
 0x104   : > { %s1286_s10 = scalar_lea.vmem %s3640_s9, %s2838_s2  ;;  %s1282_s15 = scalar_lea.vmem %s3635_s5, %s2838_s2  ;;  %v1504_v20 = vld [vmem:[%s1293_s14] sm:$0x1]  ;;  %v3253_v22 = vld [vmem:[#allocation11] sm:$0xff]   ;;  %v3255_v48 = vld [vmem:[#allocation3] sm:$0xff]   ;;  %vm1779_vm7 = vcmask 516096   ;;  %vm2438_vm8 = vcmask 253952  }
 0x105   : > { %v1341_v4 = vld [vmem:[%s1286_s10] sm:$0xff]  ;;  %s1290_s0 = scalar_lea.vmem %s3645_s13, %s2838_s2  ;;  %v1505_v21 = vpack.c.bf16 %v1504_v20, %v1504_v20  ;;  %s4256_s16 = sld [smem:[#allocation21_spill]]  ;;  %v3256_v49 = vld [vmem:[#allocation3 + $0x8] sm:$0xff]   ;;  %v3257_v50 = vld [vmem:[#allocation3 + $0x10] sm:$0xff]  }
 0x106   : > { %v1337_v5 = vld [vmem:[%s1282_s15] sm:$0xff]  ;;  %v1342_v6 = vpack.c.bf16 %v1341_v4, %v1341_v4  ;;  %s4257_s19 = sld [smem:[#allocation22_spill]]  ;;  %v3259_v54 = vld [vmem:[#allocation6] sm:$0xff]   ;;  %v3260_v55 = vld [vmem:[#allocation6 + $0x8] sm:$0xff]   ;;  %s4258_s11 = sld [smem:[#allocation29_spill]] }
 0x107   : > { %v1338_v7 = vpack.c.bf16 %v1337_v5, %v1337_v5  ;;  %v1442_v11 = vld [vmem:[%s1290_s0] sm:$0xff]  ;;  %v3261_v56 = vld [vmem:[#allocation6 + $0x10] sm:$0xff]   ;;  %s3620_s26 = smov 112   ;;  %s3621_s2 = smov 96  }
 0x108   : > { %2949 = vmatmul.mubr.msk.bf16.vlgmr.msra.gmra.mrb[0].mxu0 %vm1344_vm2, %v1342_v6  ;;  %v1443_v13 = vpack.c.bf16 %v1442_v11, %v1442_v11  ;;  %v3254_v23 = vld [vmem:[#allocation11 + $0x8] sm:$0xff]   ;;  %s3622_s10 = smov 64   ;;  %s4259_s15 = sld [smem:[#allocation30_spill]] }
 0x109   : > { %2955 = vmatmul.mubr.msk.bf16.vlgmr.msra.gmra.mrb[0].mxu1 %vm1398_vm3, %v1338_v7  ;;  %2959 = vmatpush3.bf16.msra.mxu0 %v1449_v9  ;;  %v2845_v34 = vld [vmem:[%s4255_s18] ss:$0 sm:$0xff]  ;;  %s3623_s0 = smov 16   ;;  %s4260_s14 = sld [smem:[#allocation34_spill]] }
 0x10a   : > { %2960 = vmatprep.mubr.msk.bf16.mxu0 %vm3619_vm0, %v3618_v0  ;;  %2965 = vmatpush3.bf16.msra.mxu1 %v3245_v10  ;;  %v3258_v51 = vld [vmem:[#allocation3 + $0x18] sm:$0xff]   ;;  %s4261_s18 = sld [smem:[#allocation31_spill]]  ;;  %p4272_p4 = scmp.ne.s32.totalorder %s4244_s22, 0 }
 0x10b   : > { %2966 = vmatprep.subr.bf16.mxu1 %v3618_v0  ;;  %2980 = vmatprep.mubr.msk.bf16.mxu1 %vm3619_vm0, %v3618_v0  ;;  %s1296_s23 = scalar_lea.vmem %s4256_s16, %s4004_s28  ;;  %v3262_v57 = vld [vmem:[#allocation6 + $0x18] sm:$0xff]   ;;  %s4262_s16 = sld [smem:[#allocation32_spill]] }
 0x10c   : > { %2984 = vmatprep.subr.bf16.mxu0 %v3618_v0  ;;  %v1611_v52 = vld [vmem:[%s1296_s23] sm:$0x1]  ;;  %s1299_s27 = scalar_lea.vmem %s4257_s19, %s4004_s28  ;;  %s4263_s23 = sld [smem:[#allocation33_spill]] }
 0x10d   : > { %v1612_v53 = vpack.c.bf16 %v1611_v52, %v1611_v52  ;;  %v1690_v58 = vld [vmem:[%s1299_s27] sm:$0x1]  ;;  %s4264_s19 = sld [smem:[#allocation35_spill]]  ;;  %s4266_s27 = sld [smem:[#allocation26_spill]] }
 0x10e   : > { %2967 = vmatpush3.bf16.msra.mxu1 %v3246_v12  ;;  %v1691_v59 = vpack.c.bf16 %v1690_v58, %v1690_v58  ;;  %v2864_v60 = vld [vmem:[%s4258_s11] ss:$0 sm:$0xff]  ;;  %s4265_s11 = sld [smem:[#allocation24_spill]] }
 0x10f   : > { %2968 = vmatprep.subr.bf16.mxu1 %v3618_v0 }
 0x110   : > { %2961 = vmatmul.mubr.msk.bf16.vlgmr.msra.gmra.mrb[4].mxu0 %vm1344_vm2, %v1443_v13 }
 0x111   : > { %2992 = vmatprep.mubr.msk.bf16.mxu0 %vm3619_vm0, %v3618_v0  ;;  %2985 = vmatpush3.bf16.msra.mxu0 %v3255_v48 }
 0x112   : > { %2969 = vmatpush3.bf16.msra.mxu1 %v3247_v14  ;;  %2986 = vmatprep.subr.bf16.mxu0 %v3618_v0 }
 0x113   : > { %2970 = vmatprep.subr.bf16.mxu1 %v3618_v0 }
 0x115   : > { %2987 = vmatpush3.bf16.msra.mxu0 %v3256_v49 }
 0x116   : > { %2971 = vmatpush3.bf16.msra.mxu1 %v3248_v15  ;;  %2988 = vmatprep.subr.bf16.mxu0 %v3618_v0 }
 0x117   : > { %2972 = vmatprep.subr.bf16.mxu1 %v3618_v0 }
 0x119   : > { %2989 = vmatpush3.bf16.msra.mxu0 %v3257_v50 }
 0x11a   : > { %2973 = vmatpush3.bf16.msra.mxu1 %v3249_v16  ;;  %2990 = vmatprep.subr.bf16.mxu0 %v3618_v0 }
 0x11b   : > { %2974 = vmatprep.subr.bf16.mxu1 %v3618_v0 }
 0x11d   : > { %2991 = vmatpush3.bf16.msra.mxu0 %v3258_v51 }
 0x11e   : > { %2975 = vmatpush3.bf16.msra.mxu1 %v3250_v17  ;;  %2996 = vmatprep.subr.bf16.mxu0 %v3618_v0 }
 0x11f   : > { %2976 = vmatprep.subr.bf16.mxu1 %v3618_v0 }
 0x120   : > { %2993 = vmatmul.mubr.msk.bf16.vlgmr.msra.gmra.mrb[8].mxu0 %vm1646_vm5, %v1612_v53 }
 0x121   : > { %2997 = vmatpush3.bf16.msra.mxu0 %v3259_v54  ;;  %3004 = vmatprep.mubr.msk.bf16.mxu0 %vm3619_vm0, %v3618_v0  ;;  %v3263_v54 = vld [vmem:[#allocation12] sm:$0xff]  }
 0x122   : > { %2977 = vmatpush3.bf16.msra.mxu1 %v3251_v18  ;;  %2998 = vmatprep.subr.bf16.mxu0 %v3618_v0 }
 0x123   : > { %2978 = vmatprep.subr.bf16.mxu1 %v3618_v0 }
 0x125   : > { %2999 = vmatpush3.bf16.msra.mxu0 %v3260_v55  ;;  %v3264_v55 = vld [vmem:[#allocation12 + $0x8] sm:$0xff]  }
 0x126   : > { %2979 = vmatpush3.bf16.msra.mxu1 %v3252_v19  ;;  %3000 = vmatprep.subr.bf16.mxu0 %v3618_v0 }
 0x127   : > { %3008 = vmatprep.subr.bf16.mxu1 %v3618_v0 }
 0x129   : > { %2981 = vmatmul.mubr.bf16.vlgmr.msra.gmra.mrb[4].mxu1 %v1505_v21  ;;  %3001 = vmatpush3.bf16.msra.mxu0 %v3261_v56 }
 0x12a   : > { %3012 = vmatprep.mubr.msk.bf16.mxu1 %vm3619_vm0, %v3618_v0  ;;  %3009 = vmatpush3.bf16.msra.mxu1 %v3253_v22 }
 0x12b   : > { %3010 = vmatprep.subr.bf16.mxu1 %v3618_v0  ;;  %3002 = vmatprep.subr.bf16.mxu0 %v3618_v0 }
 0x12d   : > { %3003 = vmatpush3.bf16.msra.mxu0 %v3262_v57 }
 0x12e   : > { %3011 = vmatpush3.bf16.msra.mxu1 %v3254_v23  ;;  %3016 = vmatprep.subr.bf16.mxu0 %v3618_v0 }
 0x12f   : > { %3022 = vmatprep.subr.bf16.mxu1 %v3618_v0 }
 0x130   : > { %3005 = vmatmul.mubr.msk.bf16.vlgmr.msra.gmra.mrb[12].mxu0 %vm1646_vm5, %v1691_v59 }
 0x131   : > { %3018 = vmatprep.mubr.msk.bf16.mxu0 %vm3619_vm0, %v3618_v0 }
 0x1db   : > { %v1386_v24 = vpop.f32.mrb[0].mxu0 }
 0x1dc   : > { %v2950_v25 = vpop.f32.mrb[1].mxu0  ;;  %v1436_v26 = vpop.f32.mrb[0].mxu1 }
 0x1dd   : > { %v1437_v27 = vadd.f32 %v1436_v26, %v1386_v24  ;;  %v1389_v28 = vpop.f32.mrb[2].mxu0  ;;  %v2956_v29 = vpop.f32.mrb[1].mxu1 }
 0x1de   : > { %v2951_v30 = vpop.f32.mrb[3].mxu0  ;;  %v1439_v31 = vpop.f32.mrb[2].mxu1 }
 0x1df   : > { %v2957_v32 = vpop.f32.mrb[3].mxu1 }
 0x1e3   : > { %v1485_v33 = vpop.f32.mrb[4].mxu0 }
 0x1e4   : > { %v1491_v35 = vadd.f32 %v1485_v33, %v1437_v27  ;;  %v2962_v36 = vpop.f32.mrb[5].mxu0 }
 0x1e5   : > { %v1488_v38 = vpop.f32.mrb[6].mxu0 }
 0x1e6   : > { %v1499_v39 = vadd.f32 %v2845_v34, %v1491_v35  ;;  %v2963_v40 = vpop.f32.mrb[7].mxu0 }
 0x1e8   : > { %v1501_v41 = vadd.f32 %v1500_v37, %v1499_v39 }
 0x1ea   : > { %1503 = vst.msk [vmem:[#allocation2] sm:$0xff] %vm1502_vm4, %v1501_v41 }
 0x1f1   : > { %v4052_v42 = vld [vmem:[#allocation2] sm:$0xff] }
 0x1f2   : > { %v1782_v43 = vpack.c.bf16 %v4052_v42, %v4052_v42 }
 0x1f3   : > { %v4080_v4 = vpop.f32.mrb[8].mxu0 }
 0x1f4   : > { %3013 = vmatmul.mubr.msk.bf16.vlgmr.msra.gmra.mrb[8].mxu1 %vm1502_vm4, %v1782_v43  ;;  %v2994_v5 = vpop.f32.mrb[9].mxu0 }
 0x1f5   : > { %3024 = vmatprep.mubr.msk.bf16.mxu1 %vm3619_vm0, %v3618_v0  ;;  %v1687_v7 = vpop.f32.mrb[10].mxu0  ;;  %v2872_v5 = vld [vmem:[%s4259_s15] ss:$0 sm:$0xff]  ;;  %s4268_s15 = sld [smem:[#allocation36_spill]] }
 0x1f6   : > { %v2995_v9 = vpop.f32.mrb[11].mxu0 }
 0x1fc   : > { %v4059_v44 = vpop.f32.mrb[4].mxu1 }
 0x1fd   : > { %v2982_v45 = vpop.f32.mrb[5].mxu1 }
 0x1fe   : > { %v1608_v46 = vpop.f32.mrb[6].mxu1 }
 0x1ff   : > { %v2983_v47 = vpop.f32.mrb[7].mxu1 }
 0x203   : > { %v4087_v12 = vpop.f32.mrb[12].mxu0 }
 0x204   : > { %v3006_v13 = vpop.f32.mrb[13].mxu0 }
 0x205   : > { %v1765_v14 = vpop.f32.mrb[14].mxu0 }
 0x206   : > { %v3007_v15 = vpop.f32.mrb[15].mxu0 }
 0x2c7   : > { %v1844_v61 = vpop.f32.mrb[8].mxu1 }
 0x2c8   : > { %v1845_v62 = vadd.f32 %v2864_v60, %v1844_v61  ;;  %v3014_v63 = vpop.f32.mrb[9].mxu1 }
 0x2c9   : > { %v1847_v1 = vpop.f32.mrb[10].mxu1 }
 0x2ca   : > { %v1854_v2 = vpack.c.bf16 %v1845_v62, %v1845_v62  ;;  %1851 = vrot.lane.b32.xlu0 %v1845_v62, %s3620_s26  ;;  %v3015_v3 = vpop.f32.mrb[11].mxu1  ;;  %s3624_s26 = smov 32  }
 0x2cc   : > { %1857 = vrot.lane.b32.xlu1 %v1854_v2, %s3621_s2 }
 0x33c   : > { %v1852_v6 = vpop.permute.xlu0 %1851 }
 0x33d   : > { %v1855_v8 = vpack.c.bf16 %v1852_v6, %v1852_v6 }
 0x33e   : > { %v1858_v10 = vpop.permute.xlu1 %1857 }
 0x33f   : > { %v1864_v11 = vsel %vm1398_vm3, %v1858_v10, 0  ;;  %1907 = vrot.lane.b32.xlu0 %v1855_v8, %s3621_s2  ;;  %s4267_s2 = sld [smem:[#allocation23_spill]] }
 0x340   : > { %3017 = vmatpush3.bf16.xpose.msra.mxu0 %v1864_v11 }
 0x341   : > { %3028 = vmatprep.subr.bf16.mxu0 %v3618_v0 }
 0x347   : > { %3019 = vmatmul.mubr.msk.bf16.vlgmr.msra.gmra.mrb[16].mxu0 %vm1398_vm3, %v1854_v2 }
 0x348   : > { %3030 = vmatprep.mubr.msk.bf16.mxu0 %vm3619_vm0, %v3618_v0 }
 0x3b1   : > { %v1908_v16 = vpop.permute.xlu0 %1907 }
 0x3b2   : > { %v1913_v17 = vsel %vm1398_vm3, %v1908_v16, 0 }
 0x3b3   : > { %3023 = vmatpush3.bf16.xpose.msra.mxu1 %v1913_v17 }
 0x3b4   : > { %3034 = vmatprep.subr.bf16.mxu1 %v3618_v0 }
 0x3ba   : > { %3025 = vmatmul.mubr.msk.bf16.vlgmr.msra.gmra.mrb[12].mxu1 %vm1398_vm3, %v1855_v8 }
 0x3bb   : > { %3036 = vmatprep.mubr.msk.bf16.mxu1 %vm3619_vm0, %v3618_v0 }
 0x41a   : > { %v1900_v18 = vpop.f32.mrb[16].mxu0 }
 0x41b   : > { %v1955_v19 = vmul.f32 0.25, %v1900_v18  ;;  %v3020_v20 = vpop.f32.mrb[17].mxu0 }
 0x41c   : > { %v1903_v21 = vpop.f32.mrb[18].mxu0  ;;  %v3266_v20 = vld [vmem:[#allocation14 + $0x8] sm:$0xff]  }
 0x41d   : > { %v3021_v22 = vpop.f32.mrb[19].mxu0  ;;  %v1958_v23 = vsel %vm1344_vm2, %v1955_v19, -inf  ;;  %v3268_v21 = vld [vmem:[%s4260_s14 + $0x8] sm:$0xff]  }
 0x41e   : > { %1959 = vmax.xlane.f32.xlu0 %v1958_v23 }
 0x48d   : > { %v1949_v24 = vpop.f32.mrb[12].mxu1 }
 0x48e   : > { %v1956_v25 = vmul.f32 0.25, %v1949_v24  ;;  %v3026_v26 = vpop.f32.mrb[13].mxu1 }
 0x48f   : > { %v1952_v27 = vpop.f32.mrb[14].mxu1  ;;  %v2876_v26 = vld [vmem:[%s4261_s18] ss:$0 sm:$0xff]  ;;  %s1331_s18 = scalar_lea.vmem %s3790_s20, %s4004_s28  ;;  %s4270_s28 = sld [smem:[#allocation38_spill]] }
 0x490   : > { %v3027_v28 = vpop.f32.mrb[15].mxu1  ;;  %v1961_v29 = vsel %vm1344_vm2, %v1956_v25, -inf }
 0x491   : > { %1962 = vmax.xlane.f32.xlu1 %v1961_v29  ;;  %v2877_v28 = vld [vmem:[%s4262_s16] ss:$0 sm:$0xff] }
 0x495   : > { %s4271_s16 = smov %s4270_s28 }
 0x4a2   : > { %2031 = vrot.lane.b32.xlu1 %v1855_v8, %s3622_s10 }
 0x4ab   : > { %v1960_v30 = vpop.xlane.xlu0 %1959 }
 0x4ac   : > { %v1964_v31 = vsub.f32 %v1955_v19, %v1960_v30  ;;  %v3265_v19 = vld [vmem:[#allocation14] sm:$0xff]  }
 0x4ae   : > { %v1966_v34 = vmul.f32 1.442695, %v1964_v31 }
 0x51e   : > { %v1963_v32 = vpop.xlane.xlu1 %1962 }
 0x51f   : > { %v1965_v33 = vsub.f32 %v1956_v25, %v1963_v32  ;;  %v3269_v32 = vld [vmem:[%s4260_s14 + $0x10] sm:$0xff]  }
 0x521   : > { %v1968_v35 = vmul.f32 1.442695, %v1965_v33  ;;  %v3270_v33 = vld [vmem:[%s4260_s14 + $0x18] sm:$0xff]  }
 0x522   : > { %v2032_v36 = vpop.permute.xlu1 %2031 }
 0x523   : > { %3273 = vpow2.f32 %v1968_v35  ;;  %v2037_v37 = vsel %vm1348_vm1, %v2032_v36, 0 }
 0x524   : > { %3035 = vmatpush3.bf16.msra.mxu1 %v2037_v37  ;;  %3275 = vpow2.f32 %v1966_v34  ;;  %v2878_v34 = vld [vmem:[%s4263_s23] ss:$0 sm:$0xff]  ;;  %s1277_s23 = sand.u32 1, %s3559_s1  }
 0x525   : > { %3048 = vmatprep.subr.bf16.mxu1 %v3618_v0 }
 0x52d   : > { %v3274_v38 = vpop.eup %3273 }
 0x52e   : > { %v1973_v39 = vsel %vm1344_vm2, %v3274_v38, 0.0  ;;  %v3276_v40 = vpop.eup %3275 }
 0x52f   : > { %1974 = vadd.xlane.f32.xlu0 %v1973_v39  ;;  %v1970_v41 = vsel %vm1344_vm2, %v3276_v40, 0.0 }
 0x533   : > { %1971 = vadd.xlane.f32.xlu0 %v1970_v41 }
 0x549   : > { %1982 = vrot.lane.b32.xlu0 %v1854_v2, %s3622_s10  ;;  %s3625_s10 = smov 48  }
 0x5bc   : > { %v1975_v43 = vpop.xlane.xlu0 %1974 }
 0x5bd   : > { %3277 = vrcp.f32 %v1975_v43  ;;  %v2882_v43 = vld [vmem:[%s4264_s19] ss:$0 sm:$0xff]  ;;  %s2893_s19 = sshll.u32 %s3567_s7, 4  ;;  %s3626_s7 = smov [#allocation15]  }
 0x5c0   : > { %v1972_v45 = vpop.xlane.xlu0 %1971 }
 0x5c1   : > { %3279 = vrcp.f32 %v1972_v45 }
 0x5c4   : > { %v1983_v46 = vpop.permute.xlu0 %1982 }
 0x5c5   : > { %v1989_v47 = vsel %vm1348_vm1, %v1983_v46, 0 }
 0x5c6   : > { %3029 = vmatpush3.bf16.msra.mxu0 %v1989_v47 }
 0x5c7   : > { %v3278_v48 = vpop.eup %3277  ;;  %3040 = vmatprep.subr.bf16.mxu0 %v3618_v0 }
 0x5c8   : > { %v1979_v49 = vmul.f32 %v3278_v48, %v3274_v38 }
 0x5ca   : > { %v1981_v50 = vpack.c.bf16 %v1979_v49, %v1979_v49 }
 0x5cb   : > { %v3280_v51 = vpop.eup %3279 }
 0x5cc   : > { %v1978_v52 = vmul.f32 %v3280_v51, %v3276_v40  ;;  %3037 = vmatmul.mubr.msk.bf16.vlgmr.msra.gmra.mrb[16].mxu1 %vm1344_vm2, %v1981_v50 }
 0x5cd   : > { %3052 = vmatprep.mubr.msk.bf16.mxu1 %vm3619_vm0, %v3618_v0  ;;  %3049 = vmatpush3.bf16.msra.mxu1 %v3265_v19 }
 0x5ce   : > { %v1980_v53 = vpack.c.bf16 %v1978_v52, %v1978_v52  ;;  %3050 = vmatprep.subr.bf16.mxu1 %v3618_v0  ;;  %v1621_v52 = vld [vmem:[%s4265_s11] sm:$0x1]  ;;  %s1278_s11 = scalar_lea.vmem [#allocation15], %s1277_s23 }
 0x5d0   : > { %3031 = vmatmul.mubr.msk.bf16.vlgmr.msra.gmra.mrb[20].mxu0 %vm1344_vm2, %v1980_v53  ;;  %v1685_v53 = vadd.f32 %v4080_v4, %v1621_v52  ;;  %v3272_v4 = vld [vmem:[%s3780_s25 + $0x8] sm:$0xff]  }
 0x5d1   : > { %3044 = vmatprep.mubr.msk.bf16.mxu0 %vm3619_vm0, %v3618_v0  ;;  %3041 = vmatpush3.bf16.msra.mxu0 %v3263_v54 }
 0x5d2   : > { %3042 = vmatprep.subr.bf16.mxu0 %v3618_v0  ;;  %3051 = vmatpush3.bf16.msra.mxu1 %v3266_v20 }
 0x5d3   : > { %3068 = vmatprep.subr.bf16.mxu1 %v3618_v0 }
 0x5d5   : > { %3043 = vmatpush3.bf16.msra.mxu0 %v3264_v55 }
 0x5d6   : > { %3056 = vmatprep.subr.bf16.mxu0 %v3618_v0 }
 0x69f   : > { %v2073_v56 = vpop.f32.mrb[16].mxu1 }
 0x6a0   : > { %2080 = vrot.lane.b32.xlu1 %v2073_v56, %s3623_s0  ;;  %v3038_v57 = vpop.f32.mrb[17].mxu1  ;;  %s4269_s0 = sld [smem:[#allocation37_spill]] }
 0x6a1   : > { %v2076_v58 = vpop.f32.mrb[18].mxu1 }
 0x6a2   : > { %v3039_v59 = vpop.f32.mrb[19].mxu1 }
 0x6a3   : > { %v2025_v60 = vpop.f32.mrb[20].mxu0  ;;  %v1700_v59 = vld [vmem:[%s4266_s27] sm:$0x1]  ;;  %s2459_s27 = sshll.u32 %s1278_s11, 4  ;;  %s4160_s27 = int_to_ptr.vmem [resolvable:$true] %s2459_s27 }
 0x6a4   : > { %v3032_v61 = vpop.f32.mrb[21].mxu0 }
 0x6a5   : > { %v2028_v62 = vpop.f32.mrb[22].mxu0  ;;  %v3271_v61 = vld [vmem:[%s3780_s25] sm:$0xff]  }
 0x6a6   : > { %v3033_v63 = vpop.f32.mrb[23].mxu0  ;;  %v1522_v62 = vld [vmem:[%s4267_s2] sm:$0x1]  ;;  %s2444_s2 = scalar_lea.sflag [#allocation5], %s1277_s23 }
 0x712   : > { %v2081_v1 = vpop.permute.xlu1 %2080 }
 0x713   : > { %v2083_v2 = vsel %vm1398_vm3, %v2025_v60, %v2081_v1  ;;  %v1763_v60 = vadd.f32 %v4087_v12, %v1700_v59 }
 0x714   : > { %v2084_v3 = vpack.c.bf16 %v2083_v2, %v2083_v2 }
 0x716   : > { %3045 = vmatmul.mubr.msk.bf16.vlgmr.msra.gmra.mrb[24].mxu0 %vm1502_vm4, %v2084_v3  ;;  %v1606_v3 = vadd.f32 %v4059_v44, %v1522_v62 }
 0x717   : > { %3064 = vmatprep.mubr.msk.bf16.mxu0 %vm3619_vm0, %v3618_v0 }
 0x7e9   : > { %v2145_v6 = vpop.f32.mrb[24].mxu0 }
 0x7ea   : > { %v2146_v7 = vadd.f32 %v2872_v5, %v2145_v6  ;;  %v3046_v8 = vpop.f32.mrb[25].mxu0 }
 0x7eb   : > { %v2148_v9 = vpop.f32.mrb[26].mxu0  ;;  %v2888_v8 = vld [vmem:[%s4268_s15] ss:$0 sm:$0xff]  ;;  %s3485_s15 = sshll.u32 %s3626_s7, 4  ;;  %s3486_s15 = int_to_ptr.vmem [resolvable:$false] %s3485_s15 }
 0x7ec   : > { %v3047_v10 = vpop.f32.mrb[27].mxu0  ;;  %v2151_v11 = vadd.f32 %v2146_v7, %v4052_v42  ;;  %v3267_v42 = vld [vmem:[%s4260_s14] sm:$0xff]   ;;  %p3488_p11 = scmp.lt.s32.totalorder %s4160_s27, %s3486_s15 }
 0x7ed   : > { %3057 = vmatpush3.bf16.msra.mxu0 %v3267_v42  ;;  %v2889_v10 = vld [vmem:[%s4269_s0] ss:$0 sm:$0xff]  ;;  %s3487_s0 = scalar_lea.vmem %s3486_s15, 32 }
 0x7ee   : > { %v2154_v13 = vsel %vm1502_vm4, %v2151_v11, 0.0  ;;  %3058 = vmatprep.subr.bf16.mxu0 %v3618_v0 }
 0x7ef   : > { %2155 = vadd.xlane.f32.xlu1 %v2154_v13 }
 0x7f1   : > { %3059 = vmatpush3.bf16.msra.mxu0 %v3268_v21  ;;  %v2382_v21 = vld [vmem:[%s3785_s3] sm:$0x1] }
 0x7f2   : > { %3060 = vmatprep.subr.bf16.mxu0 %v3618_v0 }
 0x7f5   : > { %3061 = vmatpush3.bf16.msra.mxu0 %v3269_v32 }
 0x7f6   : > { %3062 = vmatprep.subr.bf16.mxu0 %v3618_v0 }
 0x7f9   : > { %3063 = vmatpush3.bf16.msra.mxu0 %v3270_v33 }
 0x87c   : > { %v2156_v14 = vpop.xlane.xlu1 %2155 }
 0x87d   : > { %v2158_v15 = vmul.f32 0.03125, %v2156_v14 }
 0x87f   : > { %v2159_v16 = vsub.f32 %v2151_v11, %v2158_v15 }
 0x881   : > { %v2160_v17 = vmul.f32 %v2159_v16, %v2159_v16 }
 0x883   : > { %v2161_v18 = vsel %vm1502_vm4, %v2160_v17, 0.0 }
 0x884   : > { %2162 = vadd.xlane.f32.xlu0 %v2161_v18 }
 0x911   : > { %v2163_v22 = vpop.xlane.xlu0 %2162 }
 0x912   : > { %v2164_v23 = vmul.f32 0.03125, %v2163_v22 }
 0x914   : > { %v2165_v24 = vadd.f32 1e-05, %v2164_v23 }
 0x916   : > { %3281 = vrsqrt.f32 %v2165_v24 }
 0x920   : > { %v3282_v25 = vpop.eup %3281 }
 0x921   : > { %v2167_v27 = vmul.f32 %v3282_v25, %v2159_v16 }
 0x923   : > { %v2174_v29 = vmul.f32 %v2876_v26, %v2167_v27 }
 0x925   : > { %v2181_v30 = vadd.f32 %v2877_v28, %v2174_v29 }
 0x927   : > { %v2182_v31 = vpack.c.bf16 %v2181_v30, %v2181_v30 }
 0x929   : > { %3053 = vmatmul.mubr.msk.bf16.vlgmr.msra.gmra.mrb[20].mxu1 %vm1502_vm4, %v2182_v31 }
 0x92a   : > { %3072 = vmatprep.mubr.msk.bf16.mxu1 %vm3619_vm0, %v3618_v0  ;;  %3069 = vmatpush3.bf16.msra.mxu1 %v3271_v61 }
 0x92b   : > { %3070 = vmatprep.subr.bf16.mxu1 %v3618_v0 }
 0x92e   : > { %3071 = vmatpush3.bf16.msra.mxu1 %v3272_v4 }
 0x9fc   : > { %v2243_v35 = vpop.f32.mrb[20].mxu1 }
 0x9fd   : > { %v2244_v36 = vadd.f32 %v2878_v34, %v2243_v35  ;;  %v3054_v37 = vpop.f32.mrb[21].mxu1 }
 0x9fe   : > { %v2246_v38 = vpop.f32.mrb[22].mxu1 }
 0x9ff   : > { %v2249_v39 = vmax.f32 %v2244_v36, 0.0  ;;  %v3055_v40 = vpop.f32.mrb[23].mxu1 }
 0xa01   : > { %v2250_v41 = vpack.c.bf16 %v2249_v39, %v2249_v39 }
 0xa03   : > { %3065 = vmatmul.mubr.msk.bf16.vlgmr.msra.gmra.mrb[28].mxu0 %vm1646_vm5, %v2250_v41 }
 0xad6   : > { %v2328_v45 = vpop.f32.mrb[28].mxu0 }
 0xad7   : > { %v2329_v46 = vadd.f32 %v2882_v43, %v2328_v45  ;;  %v3066_v47 = vpop.f32.mrb[29].mxu0 }
 0xad8   : > { %v2331_v48 = vpop.f32.mrb[30].mxu0 }
 0xad9   : > { %v3067_v49 = vpop.f32.mrb[31].mxu0  ;;  %v2334_v50 = vadd.f32 %v2329_v46, %v2181_v30 }
 0xadb   : > { %v2337_v51 = vsel %vm1502_vm4, %v2334_v50, 0.0 }
 0xadc   : > { %2338 = vadd.xlane.f32.xlu1 %v2337_v51 }
 0xaed   : > { %1769 = vrot.lane.b32.xlu1 %v1685_v53, %s3624_s26  ;;  %s4158_s26 = scalar_lea.hbm %s4270_s28, %s2893_s19 }
 0xb69   : > { %v2339_v54 = vpop.xlane.xlu1 %2338 }
 0xb6a   : > { %v2340_v55 = vmul.f32 0.03125, %v2339_v54 }
 0xb6c   : > { %v2341_v56 = vsub.f32 %v2334_v50, %v2340_v55 }
 0xb6d   : > { %v1770_v1 = vpop.permute.xlu1 %1769 }
 0xb6e   : > { %v2342_v57 = vmul.f32 %v2341_v56, %v2341_v56  ;;  %v1776_v12 = vsel %vm1502_vm4, %v1606_v3, %v1770_v1 }
 0xb70   : > { %v2343_v58 = vsel %vm1502_vm4, %v2342_v57, 0.0 }
 0xb71   : > { %2344 = vadd.xlane.f32.xlu0 %v2343_v58 }
 0xb87   : > { %1773 = vrot.lane.b32.xlu0 %v1763_v60, %s3625_s10  ;;  %s3481_s10 = scalar_lea.vmem %s4160_s27, 16 }
 0xb88   : > { %p3482_p2 = scmp.ne.s32.totalorder %s4160_s27, %s3481_s10  ;;  %p3489_p3 = scmp.lt.s32.totalorder %s3487_s0, %s3481_s10 }
 0xb8a   : > { %p3483_p8 = pnand %p3482_p2, %p4272_p4  ;;  %p3490_p5 = por %p3489_p3, %p3488_p11 }
 0xb8c   : > { %p3484_p10 = pneg %p3483_p8 }
 0xb8e   : > { %p3491_p6 = pnand %p3490_p5, %p3484_p10 }
 0xbfe   : > { %v2345_v63 = vpop.xlane.xlu0 %2344 }
 0xbff   : > { %v2346_v2 = vmul.f32 0.03125, %v2345_v63 }
 0xc01   : > { %v2347_v5 = vadd.f32 1e-05, %v2346_v2 }
 0xc02   : > { %v1774_v6 = vpop.permute.xlu0 %1773 }
 0xc03   : > { %3283 = vrsqrt.f32 %v2347_v5  ;;  %v1778_v7 = vsel %vm1777_vm6, %v1776_v12, %v1774_v6 }
 0xc04   : > { %1780 = vst.msk [vmem:[%s1331_s18] sm:$0x1] %vm1779_vm7, %v1778_v7 }
 0xc0d   : > { %v3284_v0 = vpop.eup %3283 }
 0xc0e   : > { %v2349_v9 = vmul.f32 %v3284_v0, %v2341_v56 }
 0xc10   : > { %v2356_v11 = vmul.f32 %v2888_v8, %v2349_v9 }
 0xc12   : > { %v2363_v13 = vadd.f32 %v2889_v10, %v2356_v11 }
 0xc14   : > { %2364 = vst.msk [vmem:[#allocation2] sm:$0xff] %vm1502_vm4, %v2363_v13  ;;  %v2368_v44 = vsel %vm1502_vm4, %v2363_v13, 0.0 }
 0xc15   : > { %v2369_v14 = vrot.slane %v2368_v44, 4 }
 0xc17   : > { %v2370_v15 = vadd.f32 %v2369_v14, %v2368_v44 }
 0xc19   : > { %v2371_v16 = vrot.slane %v2370_v15, 2 }
 0xc1b   : > { %v2372_v17 = vadd.f32 %v2371_v16, %v2370_v15 }
 0xc1d   : > { %v2373_v18 = vrot.slane %v2372_v17, 1 }
 0xc1f   : > { %v2374_v19 = vadd.f32 %v2373_v18, %v2372_v17 }
 0xc21   : > { %v2376_v20 = vmul.f32 0.125, %v2374_v19 }
 0xc23   : > { %v2377_v42 = vpack.c.bf16 %v2376_v20, %v2376_v20 }
 0xc25   : > { %3073 = vmatmul.mubr.msk.bf16.vlgmr.msra.gmra.mrb[24].mxu1 %vm1502_vm4, %v2377_v42 }
 0xcf8   : > { %v2432_v22 = vpop.f32.mrb[24].mxu1 }
 0xcf9   : > { %v2433_v23 = vadd.f32 %v2432_v22, %v2382_v21  ;;  %v3074_v24 = vpop.f32.mrb[25].mxu1 }
 0xcfa   : > { %v2435_v25 = vpop.f32.mrb[26].mxu1 }
 0xcfb   : > { %v3075_v26 = vpop.f32.mrb[27].mxu1  ;;  %2439 = vst.msk [vmem:[%s1278_s11] sm:$0x1] %vm2438_vm8, %v2433_v23 }
 0xcfc   : > { %3494 = shalt.err (!%p3491_p6)
}
 0xcfd   : > { %s3495_s18 = scalar_lea.hbm %s4158_s26, 16  ;;  %s3499_s28 = scalar_lea.hbm %s4271_s16, 32 }
 0xcfe   : > { %p3496_p7 = scmp.ne.s32.totalorder %s4158_s26, %s3495_s18  ;;  %p3500_p0 = scmp.lt.u32.totalorder %s4158_s26, %s4271_s16 }
 0xcff   : > { %p3501_p1 = scmp.lt.u32.totalorder %s3499_s28, %s3495_s18  ;;  %p3503_p2 = scmp.lt.u32.totalorder %s3495_s18, %s4158_s26 }
 0xd00   : > { %p3497_p9 = pnand %p3496_p7, %p4272_p4 }
 0xd01   : > { %p3502_p13 = por %p3501_p1, %p3500_p0 }
 0xd02   : > { %p3498_p12 = pneg %p3497_p9 }
 0xd03   : > { %p3504_p8 = por %p3503_p2, %p3502_p13 }
 0xd05   : > { %p3505_p10 = pnand %p3504_p8, %p3498_p12 }
 0xd07   : > { %3508 = shalt.err (!%p3505_p10)
}
 0xd08   : > { %3104 = dma.vmem_to_hbm [thread:$0]  (%p4272_p4), %s4160_s27, 16, %s4158_s26, %s2444_s2  }
 0xd09 PF: > { %s4273_s23 = sld [smem:[#allocation42_spill]]  ;;  %s4274_s19 = sld [smem:[#allocation39_spill]] }
 0xd0a   : > { %s4275_s11 = sld [smem:[#allocation44_spill]] }
 0xd0f   : > { %p3146_p11 = scmp.ge.s32.totalorder %s4273_s23, 2  ;;  %s2477_s10 = sand.u32 1, %s4274_s19  }
 0xd10   : > { %p4276_p3 = scmp.ne.s32.totalorder %s4275_s11, 0  ;;  %s2478_s7 = scalar_lea.sflag [#allocation5], %s2477_s10 }
 0xd12   : > { %p3129_p5 = pnand %p3146_p11, %p4276_p3 }
 0xd14   : > { %3550 = dma.done.wait (!%p3129_p5), %s2478_s7, 16  }
 0xd15   : > { %3552 = vsyncadd (!%p3129_p5), %s2478_s7, 4294967280  ;;  %s83_s11 = sadd.s32 1, %s4273_s23   ;;  %s4277_s15 = sld [smem:[#allocation40_spill]] }
 0xd16   : > { %p80_p6 = scmp.ge.s32.totalorder %s83_s11, 4   ;;  %s4278_s2 = sld [smem:[#allocation45_spill]] }
 0xd17   : > { %s4279_s7 = sld [smem:[#allocation41_spill]]  ;;  %s4280_s10 = sld [smem:[#allocation43_spill]] }
 0xd18   : > { %s4281_s28 = smov %s3559_s1  ;;  %82 = sbr.rel (!%p80_p6) target bundleno = 65 (0x41), region = 305 }
 0xd1b   : > { %s4282_s1 = smov %s4277_s15 }
 0xd1f   :  { %2482 = vsyncpa [#allocation4], 1 }
 0xd20   :  { %2484 = vsyncpa [#allocation4 + $0x1], 1 }
 0xd21   :  { %2485 = vsyncpa [#allocation7], 1 }
 0xd22   :  { %2486 = vsyncpa [#allocation10], 1 }
 0xd23   :  { %2487 = vsyncpa [#allocation13], 1 }
 0xd24   :  { %2488 = vsyncpa [#allocation5], 1 }
 0xd25   :  { %2490 = vsyncpa [#allocation5 + $0x1], 1 }

</bundles_post_ra>
